<compile_context>
chip_gen: v7x
topology: tpu7x:2x2x1
jax: 0.10.0
libtpu: 0.0.40
codegen_flags: <defaults>
</compile_context>

<pallas_src>
import jax
import jax.numpy as jnp
from jax.experimental import pallas as pl
from jax.experimental.pallas import tpu as pltpu

IN_FEATURES = 1024
OUT_FEATURES = 2


def _linear_kernel(x_ref, w_ref, b_ref, o_ref):
    # x_ref: (TM, 1024) VMEM, w_ref: (1024, 2) VMEM, b_ref: (1, 2) VMEM.
    acc = jnp.dot(x_ref[...], w_ref[...], preferred_element_type=jnp.float32)
    o_ref[...] = (acc + b_ref[...].astype(jnp.float32)).astype(o_ref.dtype)


def discriminator_forward(x, weight_t, bias, *, tm=2048,
                          min_pallas_batch=256, force_pallas=False):
    """x: [B, 1024], weight_t: [1024, 2], bias: [2] -> [B, 2].

    tm: batch-tile size (rows of x per grid step). 2048 f32 rows = 8 MiB per
    x buffer (16 MiB double-buffered); the scoped-VMEM limit is raised to fit.
    Small batches fall back to plain XLA (a 1-step pallas_call is pure launch
    + one exposed DMA); set force_pallas=True to exercise the kernel anyway.
    """
    B = x.shape[0]
    if B < min_pallas_batch and not force_pallas:
        # Launch-overhead dominated regime: XLA's fused gemv is as fast.
        return (x @ weight_t + bias[None, :]).astype(x.dtype)

    # Sublane multiple depends on dtype packing (f32: 8, bf16: 16, int8: 32).
    sublane = {4: 8, 2: 16, 1: 32}.get(jnp.dtype(x.dtype).itemsize, 8)
    tile_m = min(tm, B)
    tile_m = max(sublane, ((tile_m + sublane - 1) // sublane) * sublane)
    grid = (pl.cdiv(B, tile_m),)  # ragged edge block is masked by Pallas

    bias2d = bias.reshape(1, OUT_FEATURES).astype(jnp.float32)

    # Scoped-VMEM budget: 2 x-buffers + 2 out-buffers + weight/bias + slack.
    itemsize = jnp.dtype(x.dtype).itemsize
    vmem_needed = (2 * tile_m * IN_FEATURES * itemsize
                   + 2 * tile_m * OUT_FEATURES * itemsize
                   + IN_FEATURES * OUT_FEATURES * 4
                   + (2 << 20))
    vmem_limit = int(min(max(vmem_needed, 16 << 20), 48 << 20))

    # Advisory cost hint: dominated by streaming x from HBM.
    cost = pl.CostEstimate(
        flops=2 * B * IN_FEATURES * OUT_FEATURES,
        transcendentals=0,
        bytes_accessed=(B * IN_FEATURES * itemsize
                        + IN_FEATURES * OUT_FEATURES * 4
                        + B * OUT_FEATURES * itemsize),
    )

    return pl.pallas_call(
        _linear_kernel,
        out_shape=jax.ShapeDtypeStruct((B, OUT_FEATURES), x.dtype),
        grid_spec=pl.GridSpec(
            grid=grid,
            in_specs=[
                # x: one batch tile per grid step (auto double-buffered DMA).
                pl.BlockSpec((tile_m, IN_FEATURES), lambda i: (i, 0)),
                # weight / bias: same block every step -> VMEM-resident.
                pl.BlockSpec((IN_FEATURES, OUT_FEATURES), lambda i: (0, 0)),
                pl.BlockSpec((1, OUT_FEATURES), lambda i: (0, 0)),
            ],
            out_specs=pl.BlockSpec((tile_m, OUT_FEATURES), lambda i: (i, 0)),
        ),
        compiler_params=pltpu.CompilerParams(
            # Batch axis is independent -> shardable across v7x's 2 TCs.
            dimension_semantics=("parallel",),
            vmem_limit_bytes=vmem_limit,
        ),
        cost_estimate=cost,
    )(x, weight_t, bias2d)


def init_params(key):
    # Mirrors nn.Linear default init (uniform +/- 1/sqrt(fan_in)); exact
    # distribution is irrelevant for the kernel. PyTorch stores [out, in];
    # we keep the transposed [in, out] copy for x @ W.
    kw, kb = jax.random.split(key)
    bound = 1.0 / jnp.sqrt(jnp.float32(IN_FEATURES))
    weight = jax.random.uniform(
        kw, (OUT_FEATURES, IN_FEATURES), jnp.float32, -bound, bound)
    bias = jax.random.uniform(
        kb, (OUT_FEATURES,), jnp.float32, -bound, bound)
    return weight.T, bias


if __name__ == "__main__":
    key = jax.random.PRNGKey(0)
    kx, kp = jax.random.split(key)

    weight_t, bias = init_params(kp)

    # 1) Pallas path: ragged batch (300 = 2*128 + 44) with a small tile so the
    #    grid has multiple steps and a masked partial edge block.
    B = 300
    x = jax.random.normal(kx, (B, IN_FEATURES), jnp.float32)
    out = discriminator_forward(x, weight_t, bias, tm=128, force_pallas=True)
    out = jax.block_until_ready(out)
    ref = x @ weight_t + bias[None, :]
    assert out.shape == (B, OUT_FEATURES)
    assert jnp.allclose(out, ref, atol=1e-4, rtol=1e-4)

    # 2) Tiny-batch dispatch path (plain XLA gemv), semantics unchanged.
    xs = jax.random.normal(kx, (8, IN_FEATURES), jnp.float32)
    outs = jax.block_until_ready(discriminator_forward(xs, weight_t, bias))
    refs = xs @ weight_t + bias[None, :]
    assert outs.shape == (8, OUT_FEATURES)
    assert jnp.allclose(outs, refs, atol=1e-4, rtol=1e-4)

    print("KERNEL_OK")
</pallas_src>

<mosaic_0001>
module attributes {stable_mosaic.version = 11 : i64} {
  func.func @_linear_kernel(%arg0: i32, %arg1: memref<128x1024xf32, #tpu.memory_space<vmem>>, %arg2: memref<1024x2xf32, #tpu.memory_space<vmem>>, %arg3: memref<1x2xf32, #tpu.memory_space<vmem>>, %arg4: memref<128x2xf32, #tpu.memory_space<vmem>>) attributes {dimension_semantics = [#tpu.dimension_semantics<parallel>], iteration_bounds = array<i64: 3>, scalar_prefetch = 0 : i64, scratch_operands = 0 : i64, tpu.core_type = #tpu.core_type<tc>, window_params = [{transform_indices = @transform_0, window_bounds = array<i64: 128, 1024>}, {pipeline_mode = #tpu.pipeline_mode<synchronous>, transform_indices = @transform_1, window_bounds = array<i64: 1024, 2>}, {pipeline_mode = #tpu.pipeline_mode<synchronous>, transform_indices = @transform_2, window_bounds = array<i64: 1, 2>}, {transform_indices = @transform_3, window_bounds = array<i64: 128, 2>}]} {
    %c0 = arith.constant 0 : index
    %c0_0 = arith.constant 0 : index
    %0 = vector.load %arg1[%c0, %c0_0] : memref<128x1024xf32, #tpu.memory_space<vmem>>, vector<128x1024xf32>
    %c0_1 = arith.constant 0 : index
    %c0_2 = arith.constant 0 : index
    %1 = vector.load %arg2[%c0_1, %c0_2] : memref<1024x2xf32, #tpu.memory_space<vmem>>, vector<1024x2xf32>
    %cst = arith.constant dense<0.000000e+00> : vector<128x2xf32>
    %2 = tpu.matmul %0, %1, %cst {dimension_numbers = #tpu.dot_dimension_numbers<[1], [0], [0], [1], [0, 0, 1, 1], [], []>} : vector<128x1024xf32>, vector<1024x2xf32>, vector<128x2xf32> -> vector<128x2xf32>
    %c0_3 = arith.constant 0 : index
    %c0_4 = arith.constant 0 : index
    %3 = vector.load %arg3[%c0_3, %c0_4] : memref<1x2xf32, #tpu.memory_space<vmem>>, vector<1x2xf32>
    %4 = vector.broadcast %3 : vector<1x2xf32> to vector<128x2xf32>
    %5 = arith.addf %2, %4 : vector<128x2xf32>
    %c0_5 = arith.constant 0 : index
    %c0_6 = arith.constant 0 : index
    %6 = vector.load %arg4[%c0_5, %c0_6] : memref<128x2xf32, #tpu.memory_space<vmem>>, vector<128x2xf32>
    tpu.vector_store %arg4[%c0_5, %c0_6], %5 {strides = array<i32>} : memref<128x2xf32, #tpu.memory_space<vmem>>, vector<128x2xf32>,
    return
  }
  func.func @transform_0(%arg0: i32) -> (i32, i32) {
    %c0_i32 = arith.constant 0 : i32
    %c0_i32_0 = arith.constant 0 : i32
    return %arg0, %c0_i32 : i32, i32
  }
  func.func @transform_1(%arg0: i32) -> (i32, i32) {
    %c0_i32 = arith.constant 0 : i32
    %c0_i32_0 = arith.constant 0 : i32
    %c0_i32_1 = arith.constant 0 : i32
    return %c0_i32, %c0_i32_0 : i32, i32
  }
  func.func @transform_2(%arg0: i32) -> (i32, i32) {
    %c0_i32 = arith.constant 0 : i32
    %c0_i32_0 = arith.constant 0 : i32
    %c0_i32_1 = arith.constant 0 : i32
    return %c0_i32, %c0_i32_0 : i32, i32
  }
  func.func @transform_3(%arg0: i32) -> (i32, i32) {
    %c0_i32 = arith.constant 0 : i32
    %c0_i32_0 = arith.constant 0 : i32
    return %arg0, %c0_i32 : i32, i32
  }
}

</mosaic_0001>

<bundles_post_ra>
// kernel: tpu_custom_call.1
= control target key start
LH: loop header
LB: loop body
LE: loop exit
PB: predicated region body
PF: predicated region fallthrough
CT: control target
= control target key end

     0   :  { %8 = vsyncpa [#allocation3], 0  ;;  %s3014_s0 = inlined_call_operand.hbm [shape: f32[300,1024], index: 0, kind: input, shape index: {}]   ;;  %s3015_s1 = inlined_call_operand.vmem [shape: f32[1024,2], index: 1, kind: input, shape index: {}]   ;;  %s3016_s2 = inlined_call_operand.hbm [shape: f32[1,2], index: 2, kind: input, shape index: {}]   ;;  %s3017_s3 = inlined_call_operand.vmem [shape: f32[300,2], index: 3, kind: output, shape index: {}]  }
   0x1   :  { %10 = vsyncpa [#allocation3 + $0x1], 0 }
   0x2   :  { %11 = vsyncpa [#allocation5], 0  ;;  %s2156_s12 = smov 0   ;;  %s2158_s13 = smov 0  }
   0x3   :  { %s2160_s14 = smov 0   ;;  %s2162_s15 = smov 0  }
   0x4 LB: > { %s2175_s16 = sadd.s32 4294967295, %s2098_s15   ;;  %s2178_s17 = sadd.s32 1, %s2098_s15   ;;  %s2098_s15 = sphi %s2162_s15, %s3038_s15   ;;  %s2094_s14 = sphi %s2160_s14, %s3037_s14   ;;  %s2090_s13 = sphi %s2158_s13, %s3036_s13   ;;  %s2086_s12 = sphi %s2156_s12, %s3035_s12  }
   0x5   : > { %s21_s18 = ssub.s32 %s2098_s15, %s2178_s17  ;;  %s24_s19 = sadd.s32 1, %s2094_s14 }
   0x6   : > { %p22_p0 = scmp.eq.s32.totalorder %s21_s18, 0  ;;  %p31_p1 = scmp.ne.s32.totalorder %s2094_s14, %s2090_s13 }
   0x7   : > { %p32_p2 = scmp.eq.s32.totalorder %s2098_s15, 0  ;;  %p37_p3 = scmp.ne.s32.totalorder %s2090_s13, %s2086_s12 }
   0x8   : > { %s2188_s20 = scalar_select %p22_p0, %s2094_s14, %s24_s19  }
   0x9   : > { %p2190_p4 = por %p32_p2, %p31_p1  ;;  %p3018_p5 = scmp.eq.s32.totalorder %s2175_s16, 0 }
   0xa   : > { %p103_p6 = scmp.eq.s32.totalorder %s2175_s16, 2  ;;  %p1374_p7 = scmp.ge.s32.totalorder %s2098_s15, 1 }
   0xb   : > { %s3021_s21 = scalar_select %p2190_p4, 1, 0 }
   0xc   : > { %p2199_p8 = por %p3018_p5, %p37_p3  ;;  %p116_p9 = scmp.lt.s32.totalorder %s2098_s15, 4 }
   0xd   : > { %p2204_p10 = por %p103_p6, %p31_p1  ;;  %s2132_s25 = smov [#allocation4]  }
   0xe   : > { %s3022_s22 = scalar_select %p2199_p8, 1, 0 }
   0xf   : > { %s3023_s23 = scalar_select %p2204_p10, 1, 0 }
  0x10   : > { %p2208_p11 = pnand %p1374_p7, %p116_p9  ;;  %s132_s26 = sshll.u32 %s2132_s25, 4  ;;  %s133_s26 = int_to_ptr.vmem [resolvable:$true] %s132_s26 }
  0x11   : > { %s1972_s30 = scalar_lea.hbm %s3016_s2, 16 }
  0x12   : > { %s3024_s24 = scalar_select %p2208_p11, 1, 0 }
  0x13   : > { %p1867_p12 = pneg %p2208_p11  ;;  %p1973_p0 = scmp.ne.s32.totalorder %s3016_s2, %s1972_s30 }
  0x14   : > { %p1979_p6 = scmp.lt.u32.totalorder %s1972_s30, %s3016_s2 }
  0x15   : > { %p2216_p13 = pnand %p1867_p12, %p3018_p5 }
  0x17   : > { %p1974_p1 = pneg %p2216_p13 }
  0x19   : > { %p1975_p2 = pnand %p1974_p1, %p1973_p0 }
  0x1b   : > { %p1976_p3 = pneg %p1975_p2 }
  0x1d   : > { %p1981_p7 = pnand %p1979_p6, %p1976_p3 }
  0x1f   : > { %1984 = shalt.err (!%p1981_p7)
}
  0x20   : > { %s1985_s8 = scalar_lea.vmem %s133_s26, 16  ;;  %s1992_s9 = scalar_lea.vmem %s133_s26, 32 }
  0x21   : > { %p1986_p9 = scmp.ne.s32.totalorder %s133_s26, %s1985_s8  ;;  %p1993_p10 = scmp.lt.s32.totalorder %s133_s26, %s133_s26 }
  0x22   : > { %p1994_p8 = scmp.lt.s32.totalorder %s1992_s9, %s1985_s8 }
  0x23   : > { %p1988_p12 = pnand %p1986_p9, %p1974_p1 }
  0x24   : > { %p1995_p11 = por %p1994_p8, %p1993_p10 }
  0x25   : > { %p1989_p5 = pneg %p1988_p12 }
  0x27   : > { %p1996_p4 = pnand %p1995_p11, %p1989_p5 }
  0x29   : > { %1999 = shalt.err (!%p1996_p4)
}
  0x2a   : > { %1870 = dma.hbm_to_vmem [thread:$0]  (!%p2216_p13), %s3016_s2, 16, %s133_s26, [#allocation5]  }
  0x2b   : > { %p1376_p0 = scmp.ge.s32.totalorder %s2098_s15, 3 }
  0x2c   : > { %p3026_p2 = scmp.ne.s32.totalorder (!%p1376_p0), %s3021_s21, 0 }
  0x2d   : > { %139 = sbr.rel (%p1376_p0) target bundleno = 87 (0x57), region = 24 }
  0x34   : > { %142 = sbr.rel (!%p3026_p2) target bundleno = 87 (0x57), region = 28  ;;  %s143_s12 = sand.u32 (%p3026_p2), 1, %s2094_s14  }
  0x35   : > { %s1378_s18 = sshll.u32 (%p3026_p2), %s2098_s15, 4  ;;  %s1377_s19 = sshll.u32 (%p3026_p2), %s143_s12, 10 }
  0x36   : > { %s149_s25 = ssub.s32 (%p3026_p2), 38, %s1378_s18  ;;  %s2244_s29 = scalar_lea.sflag (%p3026_p2), [#allocation3], %s143_s12 }
  0x37   : > { %p150_p5 = scmp.lt.s32.totalorder (%p3026_p2), %s149_s25, 16  ;;  %s147_s26 = scalar_lea.vmem (%p3026_p2), [#allocation2], %s1377_s19 }
  0x3b   : > { %s3040_s25 = smov (!%p150_p5, %s149_s25), 16 }
  0x3c   : > { %s2241_s28 = sshll.u32 %s3040_s25, 10 }
  0x3d   : > { %s155_s27 = ssub.s32 16384, %s2241_s28 }
  0x3e   : > { %156 = vsyncadd %s2244_s29, %s155_s27  ;;  %p1381_p4 = scmp.ne.s32.totalorder %s2241_s28, 0  ;;  %s1410_s21 = sshll.u32 %s2098_s15, 14 }
  0x3f   : > { %s2252_s5 = scalar_lea.hbm %s3014_s0, %s1410_s21  ;;  %s162_s6 = sshll.u32 %s147_s26, 4  ;;  %s2254_s6 = int_to_ptr.vmem [resolvable:$true] %s162_s6 }
  0x40   : > { %s2000_s7 = scalar_lea.hbm %s2252_s5, %s2241_s28  ;;  %s2004_s15 = scalar_lea.hbm %s3014_s0, 38912 }
  0x41   : > { %p2001_p8 = scmp.ne.s32.totalorder %s2252_s5, %s2000_s7  ;;  %p2005_p13 = scmp.lt.u32.totalorder %s2252_s5, %s3014_s0 }
  0x42   : > { %p2006_p1 = scmp.lt.u32.totalorder %s2004_s15, %s2000_s7  ;;  %p2008_p6 = scmp.lt.u32.totalorder %s2000_s7, %s2252_s5 }
  0x43   : > { %p2002_p10 = pnand %p2001_p8, %p1381_p4 }
  0x44   : > { %p2007_p3 = por %p2006_p1, %p2005_p13 }
  0x45   : > { %p2003_p11 = pneg %p2002_p10 }
  0x46   : > { %p2009_p7 = por %p2008_p6, %p2007_p3 }
  0x48   : > { %p2010_p9 = pnand %p2009_p7, %p2003_p11 }
  0x4a   : > { %2013 = shalt.err (!%p2010_p9)
}
  0x4b   : > { %s2014_s12 = scalar_lea.vmem %s2254_s6, %s2241_s28  ;;  %s2133_s18 = smov [#allocation2]  }
  0x4c   : > { %p2015_p12 = scmp.ne.s32.totalorder %s2254_s6, %s2014_s12  ;;  %s2018_s19 = sshll.u32 %s2133_s18, 4  ;;  %s2019_s19 = int_to_ptr.vmem [resolvable:$false] %s2018_s19 }
  0x4d   : > { %s2020_s25 = scalar_lea.vmem %s2019_s19, 32768  ;;  %p2021_p5 = scmp.lt.s32.totalorder %s2254_s6, %s2019_s19 }
  0x4e   : > { %p2016_p0 = pnand %p2015_p12, %p1381_p4  ;;  %p2022_p8 = scmp.lt.s32.totalorder %s2020_s25, %s2014_s12 }
  0x50   : > { %p2017_p2 = pneg %p2016_p0  ;;  %p2023_p10 = por %p2022_p8, %p2021_p5 }
  0x52   : > { %p2024_p13 = pnand %p2023_p10, %p2017_p2 }
  0x54   : > { %2027 = shalt.err (!%p2024_p13)
}
  0x55   : > { %s2134_s27 = smov 1024   ;;  %s2135_s26 = smov 64  }
  0x56   : > { %168 = dma.hbm_to_vmem [thread:$0]  (%p1381_p4), %s2252_s5, %s2241_s28, %s2254_s6, %s2244_s29, %s2134_s27, %s2134_s27, %s2135_s26  }
  0x57 PF: > { %p3027_p11 = scmp.ne.s32.totalorder %s3024_s24, 0 }
  0x58   : > { %s2284_s21 = sand.u32 (!%p3027_p11), 1, %s2090_s13   ;;  %p3028_p1 = scmp.ne.s32.totalorder (!%p3027_p11), %s3022_s22, 0 }
  0x59   : > { %174 = sbr.rel (%p3027_p11) target bundleno = 528 (0x210), region = 32  ;;  %s1387_s30 = sshll.u32 (!%p3027_p11), %s2284_s21, 10 }
  0x5a   : > { %s177_s4 = scalar_lea.sflag (!%p3027_p11), [#allocation3], %s2284_s21  ;;  %s2288_s7 = scalar_lea.vmem (!%p3027_p11), [#allocation2], %s1387_s30 }
  0x60   : > { %2077 = dma.done.wait (%p3028_p1), %s177_s4, 16384  }
  0x61   : > { %2079 = vsyncadd (%p3028_p1), %s177_s4, 4294950912  ;;  %p3029_p4 = scmp.eq.s32.totalorder %s2175_s16, 0 }
  0x63   : > { %2081 = dma.done.wait (%p3029_p4), [#allocation5], 16   ;;  %p3030_p3 = pmov %p3029_p4 }
  0x64   : > { %v361_v0 = vld [vmem:[%s3015_s1 + $0x80] sm:$0xff]  ;;  %v362_v1 = vld [vmem:[%s3015_s1 + $0x88] sm:$0xff]  ;;  %v363_v11 = vld [vmem:[%s3015_s1 + $0x90] sm:$0xff]  ;;  %vm1060_vm0 = vcmask 15360   ;;  %p3031_p6 = scmp.ne.s32.totalorder %s3023_s23, 0 }
  0x65   : > { %2083 = vsyncadd (%p3030_p3), [#allocation5], 4294967280  ;;  %v345_v2 = vld [vmem:[%s3015_s1] sm:$0xff]  ;;  %v1734_v3 = vpack.c.bf16 %v362_v1, %v361_v0  ;;  %v346_v4 = vld [vmem:[%s3015_s1 + $0x8] sm:$0xff]  ;;  %s1411_s11 = sshll.u32 (%p3031_p6), %s2175_s16, 7 }
  0x66   : > { %v393_v5 = vld [vmem:[%s3015_s1 + $0x180] sm:$0xff]  ;;  %v394_v6 = vld [vmem:[%s3015_s1 + $0x188] sm:$0xff]  ;;  %v1736_v7 = vpack.c.bf16 %v346_v4, %v345_v2  ;;  %v364_v13 = vld [vmem:[%s3015_s1 + $0x98] sm:$0xff]  ;;  %s2918_s25 = scalar_lea.vmem (%p3031_p6), %s3017_s3, %s1411_s11  }
  0x67   : > { %v1766_v8 = vpack.c.bf16 %v394_v6, %v393_v5  ;;  %v377_v9 = vld [vmem:[%s3015_s1 + $0x100] sm:$0xff]  ;;  %v378_v10 = vld [vmem:[%s3015_s1 + $0x108] sm:$0xff]  ;;  %1735 = vmatprep.subr.bf16.mxu0 %v1734_v3  ;;  %v347_v14 = vld [vmem:[%s3015_s1 + $0x10] sm:$0xff]  ;;  %v1738_v16 = vpack.c.bf16 %v364_v13, %v363_v11 }
  0x68   : > { %v1768_v12 = vpack.c.bf16 %v378_v10, %v377_v9  ;;  %v348_v15 = vld [vmem:[%s3015_s1 + $0x18] sm:$0xff]  ;;  %1737 = vmatpush3.bf16.msra.mxu0 %v1736_v7  ;;  %v395_v18 = vld [vmem:[%s3015_s1 + $0x190] sm:$0xff]  ;;  %v365_v23 = vld [vmem:[%s3015_s1 + $0xa0] sm:$0xff] }
  0x69   : > { %1767 = vmatprep.subr.bf16.mxu1 %v1766_v8  ;;  %v1740_v17 = vpack.c.bf16 %v348_v15, %v347_v14  ;;  %v396_v19 = vld [vmem:[%s3015_s1 + $0x198] sm:$0xff]  ;;  %v379_v20 = vld [vmem:[%s3015_s1 + $0x110] sm:$0xff]  ;;  %v366_v24 = vld [vmem:[%s3015_s1 + $0xa8] sm:$0xff]  ;;  %1739 = vmatprep.subr.bf16.mxu0 %v1738_v16 }
  0x6a   : > { %1769 = vmatpush3.bf16.msra.mxu1 %v1768_v12  ;;  %v1770_v21 = vpack.c.bf16 %v396_v19, %v395_v18  ;;  %v380_v22 = vld [vmem:[%s3015_s1 + $0x118] sm:$0xff]  ;;  %v1742_v26 = vpack.c.bf16 %v366_v24, %v365_v23  ;;  %v349_v27 = vld [vmem:[%s3015_s1 + $0x20] sm:$0xff]  ;;  %v350_v28 = vld [vmem:[%s3015_s1 + $0x28] sm:$0xff] }
  0x6b   : > { %v1772_v25 = vpack.c.bf16 %v380_v22, %v379_v20  ;;  %v397_v29 = vld [vmem:[%s3015_s1 + $0x1a0] sm:$0xff]  ;;  %v398_v30 = vld [vmem:[%s3015_s1 + $0x1a8] sm:$0xff]  ;;  %v1744_v33 = vpack.c.bf16 %v350_v28, %v349_v27  ;;  %v367_v35 = vld [vmem:[%s3015_s1 + $0xb0] sm:$0xff] }
  0x6c   : > { %1771 = vmatprep.subr.bf16.mxu1 %v1770_v21  ;;  %v381_v31 = vld [vmem:[%s3015_s1 + $0x120] sm:$0xff]  ;;  %v382_v32 = vld [vmem:[%s3015_s1 + $0x128] sm:$0xff]  ;;  %1741 = vmatpush3.bf16.msra.mxu0 %v1740_v17  ;;  %v1774_v34 = vpack.c.bf16 %v398_v30, %v397_v29  ;;  %v368_v36 = vld [vmem:[%s3015_s1 + $0xb8] sm:$0xff] }
  0x6d   : > { %v351_v37 = vld [vmem:[%s3015_s1 + $0x30] sm:$0xff]  ;;  %1743 = vmatprep.subr.bf16.mxu0 %v1742_v26  ;;  %v1776_v38 = vpack.c.bf16 %v382_v32, %v381_v31  ;;  %v1746_v39 = vpack.c.bf16 %v368_v36, %v367_v35  ;;  %v352_v40 = vld [vmem:[%s3015_s1 + $0x38] sm:$0xff]  ;;  %v369_v46 = vld [vmem:[%s3015_s1 + $0xc0] sm:$0xff] }
  0x6e   : > { %1773 = vmatpush3.bf16.msra.mxu1 %v1772_v25  ;;  %v399_v41 = vld [vmem:[%s3015_s1 + $0x1b0] sm:$0xff]  ;;  %v400_v42 = vld [vmem:[%s3015_s1 + $0x1b8] sm:$0xff]  ;;  %v370_v47 = vld [vmem:[%s3015_s1 + $0xc8] sm:$0xff]  ;;  %v1748_v48 = vpack.c.bf16 %v352_v40, %v351_v37 }
  0x6f   : > { %1775 = vmatprep.subr.bf16.mxu1 %v1774_v34  ;;  %v1778_v43 = vpack.c.bf16 %v400_v42, %v399_v41  ;;  %v383_v44 = vld [vmem:[%s3015_s1 + $0x130] sm:$0xff]  ;;  %v384_v45 = vld [vmem:[%s3015_s1 + $0x138] sm:$0xff]  ;;  %v401_v49 = vld [vmem:[%s3015_s1 + $0x1c0] sm:$0xff]  ;;  %v1750_v52 = vpack.c.bf16 %v370_v47, %v369_v46 }
  0x70   : > { %1745 = vmatpush3.bf16.msra.mxu0 %v1744_v33  ;;  %v402_v50 = vld [vmem:[%s3015_s1 + $0x1c8] sm:$0xff]  ;;  %v1780_v51 = vpack.c.bf16 %v384_v45, %v383_v44  ;;  %v353_v53 = vld [vmem:[%s3015_s1 + $0x40] sm:$0xff]  ;;  %v371_v58 = vld [vmem:[%s3015_s1 + $0xd0] sm:$0xff] }
  0x71   : > { %1747 = vmatprep.subr.bf16.mxu0 %v1746_v39  ;;  %v354_v54 = vld [vmem:[%s3015_s1 + $0x48] sm:$0xff]  ;;  %v385_v55 = vld [vmem:[%s3015_s1 + $0x140] sm:$0xff]  ;;  %v1782_v56 = vpack.c.bf16 %v402_v50, %v401_v49  ;;  %v372_v59 = vld [vmem:[%s3015_s1 + $0xd8] sm:$0xff] }
  0x72   : > { %1777 = vmatpush3.bf16.msra.mxu1 %v1776_v38  ;;  %v386_v57 = vld [vmem:[%s3015_s1 + $0x148] sm:$0xff]  ;;  %v403_v60 = vld [vmem:[%s3015_s1 + $0x1d0] sm:$0xff]  ;;  %v404_v61 = vld [vmem:[%s3015_s1 + $0x1d8] sm:$0xff]  ;;  %v1752_v62 = vpack.c.bf16 %v354_v54, %v353_v53  ;;  %v1754_v0 = vpack.c.bf16 %v372_v59, %v371_v58 }
  0x73   : > { %1779 = vmatprep.subr.bf16.mxu1 %v1778_v43  ;;  %v1784_v63 = vpack.c.bf16 %v386_v57, %v385_v55  ;;  %v355_v1 = vld [vmem:[%s3015_s1 + $0x50] sm:$0xff]  ;;  %v356_v2 = vld [vmem:[%s3015_s1 + $0x58] sm:$0xff]  ;;  %v1786_v4 = vpack.c.bf16 %v404_v61, %v403_v60  ;;  %v373_v6 = vld [vmem:[%s3015_s1 + $0xe0] sm:$0xff] }
  0x74   : > { %1749 = vmatpush3.bf16.msra.mxu0 %v1748_v48  ;;  %v387_v3 = vld [vmem:[%s3015_s1 + $0x150] sm:$0xff]  ;;  %v388_v5 = vld [vmem:[%s3015_s1 + $0x158] sm:$0xff]  ;;  %v374_v7 = vld [vmem:[%s3015_s1 + $0xe8] sm:$0xff]  ;;  %v1756_v10 = vpack.c.bf16 %v356_v2, %v355_v1 }
  0x75   : > { %1751 = vmatprep.subr.bf16.mxu0 %v1750_v52  ;;  %v405_v8 = vld [vmem:[%s3015_s1 + $0x1e0] sm:$0xff]  ;;  %v406_v9 = vld [vmem:[%s3015_s1 + $0x1e8] sm:$0xff]  ;;  %v1788_v13 = vpack.c.bf16 %v388_v5, %v387_v3  ;;  %v1758_v14 = vpack.c.bf16 %v374_v7, %v373_v6  ;;  %v375_v19 = vld [vmem:[%s3015_s1 + $0xf0] sm:$0xff] }
  0x76   : > { %1781 = vmatpush3.bf16.msra.mxu1 %v1780_v51  ;;  %v357_v11 = vld [vmem:[%s3015_s1 + $0x60] sm:$0xff]  ;;  %v218_v12 = vld [vmem:[%s2288_s7 + $0x8] sm:$0xff]  ;;  %v1790_v18 = vpack.c.bf16 %v406_v9, %v405_v8  ;;  %v376_v20 = vld [vmem:[%s3015_s1 + $0xf8] sm:$0xff] }
  0x77   : > { %1783 = vmatprep.subr.bf16.mxu1 %v1782_v56  ;;  %v358_v15 = vld [vmem:[%s3015_s1 + $0x68] sm:$0xff]  ;;  %v389_v16 = vld [vmem:[%s3015_s1 + $0x160] sm:$0xff]  ;;  %544 = vmatprep.mubr.f32.mxu0 %v218_v12  ;;  %v220_v21 = vld [vmem:[%s2288_s7 + $0x18] sm:$0xff]  ;;  %v1762_v26 = vpack.c.bf16 %v376_v20, %v375_v19 }
  0x78   : > { %1753 = vmatpush3.bf16.msra.mxu0 %v1752_v62  ;;  %v390_v17 = vld [vmem:[%s3015_s1 + $0x168] sm:$0xff]  ;;  %v407_v22 = vld [vmem:[%s3015_s1 + $0x1f0] sm:$0xff]  ;;  %v408_v23 = vld [vmem:[%s3015_s1 + $0x1f8] sm:$0xff]  ;;  %689 = vmatprep.mubr.f32.mxu1 %v220_v21  ;;  %v1760_v24 = vpack.c.bf16 %v358_v15, %v357_v11 }
  0x79   : > { %1755 = vmatprep.subr.bf16.mxu0 %v1754_v0  ;;  %v1792_v25 = vpack.c.bf16 %v390_v17, %v389_v16  ;;  %v359_v27 = vld [vmem:[%s3015_s1 + $0x70] sm:$0xff]  ;;  %v360_v28 = vld [vmem:[%s3015_s1 + $0x78] sm:$0xff]  ;;  %v1794_v30 = vpack.c.bf16 %v408_v23, %v407_v22  ;;  %v425_v32 = vld [vmem:[%s3015_s1 + $0x280] sm:$0xff] }
  0x7a   : > { %1785 = vmatpush3.bf16.msra.mxu1 %v1784_v63  ;;  %v391_v29 = vld [vmem:[%s3015_s1 + $0x170] sm:$0xff]  ;;  %v392_v31 = vld [vmem:[%s3015_s1 + $0x178] sm:$0xff]  ;;  %v426_v33 = vld [vmem:[%s3015_s1 + $0x288] sm:$0xff]  ;;  %v1764_v36 = vpack.c.bf16 %v360_v28, %v359_v27 }
  0x7b   : > { %1787 = vmatprep.subr.bf16.mxu1 %v1786_v4  ;;  %v457_v34 = vld [vmem:[%s3015_s1 + $0x380] sm:$0xff]  ;;  %v458_v35 = vld [vmem:[%s3015_s1 + $0x388] sm:$0xff]  ;;  %v1796_v37 = vpack.c.bf16 %v392_v31, %v391_v29  ;;  %v1798_v38 = vpack.c.bf16 %v426_v33, %v425_v32  ;;  %v427_v44 = vld [vmem:[%s3015_s1 + $0x290] sm:$0xff] }
  0x7c   : > { %1757 = vmatpush3.bf16.msra.mxu0 %v1756_v10  ;;  %v409_v39 = vld [vmem:[%s3015_s1 + $0x200] sm:$0xff]  ;;  %v410_v40 = vld [vmem:[%s3015_s1 + $0x208] sm:$0xff]  ;;  %v1830_v41 = vpack.c.bf16 %v458_v35, %v457_v34  ;;  %v428_v45 = vld [vmem:[%s3015_s1 + $0x298] sm:$0xff] }
  0x7d   : > { %1759 = vmatprep.subr.bf16.mxu0 %v1758_v14  ;;  %v441_v42 = vld [vmem:[%s3015_s1 + $0x300] sm:$0xff]  ;;  %v442_v43 = vld [vmem:[%s3015_s1 + $0x308] sm:$0xff]  ;;  %v1800_v47 = vpack.c.bf16 %v410_v40, %v409_v39  ;;  %v459_v48 = vld [vmem:[%s3015_s1 + $0x390] sm:$0xff]  ;;  %v1802_v54 = vpack.c.bf16 %v428_v45, %v427_v44 }
  0x7e   : > { %1789 = vmatpush3.bf16.msra.mxu1 %v1788_v13  ;;  %v217_v46 = vld [vmem:[%s2288_s7] sm:$0xff]  ;;  %v460_v49 = vld [vmem:[%s3015_s1 + $0x398] sm:$0xff]  ;;  %v219_v50 = vld [vmem:[%s2288_s7 + $0x10] sm:$0xff]  ;;  %v1832_v52 = vpack.c.bf16 %v442_v43, %v441_v42 }
  0x7f   : > { %1791 = vmatprep.subr.bf16.mxu1 %v1790_v18  ;;  %v226_v51 = vld [vmem:[%s2288_s7 + $0x48] sm:$0xff]  ;;  %v228_v53 = vld [vmem:[%s2288_s7 + $0x58] sm:$0xff]  ;;  %v411_v55 = vld [vmem:[%s3015_s1 + $0x210] sm:$0xff]  ;;  %v1834_v58 = vpack.c.bf16 %v460_v49, %v459_v48 }
  0x80   : > { %1761 = vmatpush3.bf16.msra.mxu0 %v1760_v24  ;;  %v412_v56 = vld [vmem:[%s3015_s1 + $0x218] sm:$0xff]  ;;  %v443_v57 = vld [vmem:[%s3015_s1 + $0x310] sm:$0xff]  ;;  %v429_v60 = vld [vmem:[%s3015_s1 + $0x2a0] sm:$0xff] }
  0x81   : > { %1763 = vmatprep.subr.bf16.mxu0 %v1762_v26  ;;  %v444_v59 = vld [vmem:[%s3015_s1 + $0x318] sm:$0xff]  ;;  %v430_v61 = vld [vmem:[%s3015_s1 + $0x2a8] sm:$0xff]  ;;  %v225_v62 = vld [vmem:[%s2288_s7 + $0x40] sm:$0xff]  ;;  %v1804_v4 = vpack.c.bf16 %v412_v56, %v411_v55 }
  0x82   : > { %1793 = vmatpush3.bf16.msra.mxu1 %v1792_v25  ;;  %v461_v63 = vld [vmem:[%s3015_s1 + $0x3a0] sm:$0xff]  ;;  %v462_v0 = vld [vmem:[%s3015_s1 + $0x3a8] sm:$0xff]  ;;  %v227_v1 = vld [vmem:[%s2288_s7 + $0x50] sm:$0xff]  ;;  %v1836_v5 = vpack.c.bf16 %v444_v59, %v443_v57  ;;  %v1806_v6 = vpack.c.bf16 %v430_v61, %v429_v60 }
  0x83   : > { %1795 = vmatprep.subr.bf16.mxu1 %v1794_v30  ;;  %v234_v2 = vld [vmem:[%s2288_s7 + $0x88] sm:$0xff]  ;;  %v236_v3 = vld [vmem:[%s2288_s7 + $0x98] sm:$0xff]  ;;  %v413_v7 = vld [vmem:[%s3015_s1 + $0x220] sm:$0xff]  ;;  %v1838_v10 = vpack.c.bf16 %v462_v0, %v461_v63 }
  0x84   : > { %1765 = vmatpush3.bf16.msra.mxu0 %v1764_v36  ;;  %v414_v8 = vld [vmem:[%s3015_s1 + $0x228] sm:$0xff]  ;;  %v445_v9 = vld [vmem:[%s3015_s1 + $0x320] sm:$0xff]  ;;  %v431_v12 = vld [vmem:[%s3015_s1 + $0x2b0] sm:$0xff] }
  0x85   : > { %1799 = vmatprep.subr.bf16.mxu0 %v1798_v38  ;;  %v446_v11 = vld [vmem:[%s3015_s1 + $0x328] sm:$0xff]  ;;  %v432_v13 = vld [vmem:[%s3015_s1 + $0x2b8] sm:$0xff]  ;;  %v233_v14 = vld [vmem:[%s2288_s7 + $0x80] sm:$0xff]  ;;  %v1808_v20 = vpack.c.bf16 %v414_v8, %v413_v7 }
  0x86   : > { %1797 = vmatpush3.bf16.msra.mxu1 %v1796_v37  ;;  %v463_v15 = vld [vmem:[%s3015_s1 + $0x3b0] sm:$0xff]  ;;  %v464_v16 = vld [vmem:[%s3015_s1 + $0x3b8] sm:$0xff]  ;;  %v242_v18 = vld [vmem:[%s2288_s7 + $0xc8] sm:$0xff]  ;;  %v1840_v21 = vpack.c.bf16 %v446_v11, %v445_v9  ;;  %v1810_v22 = vpack.c.bf16 %v432_v13, %v431_v12 }
  0x87   : > { %1831 = vmatprep.subr.bf16.mxu1 %v1830_v41  ;;  %545 = vmatmul.mubr.f32.vlgmr.msra.gmra.mrb[0].mxu0 %v217_v46  ;;  %v235_v17 = vld [vmem:[%s2288_s7 + $0x90] sm:$0xff]  ;;  %v244_v19 = vld [vmem:[%s2288_s7 + $0xd8] sm:$0xff]  ;;  %v1842_v26 = vpack.c.bf16 %v464_v16, %v463_v15  ;;  %v433_v28 = vld [vmem:[%s3015_s1 + $0x2c0] sm:$0xff] }
  0x88   : > { %1801 = vmatpush3.bf16.msra.mxu0 %v1800_v47  ;;  %549 = vmatprep.mubr.f32.mxu0 %v226_v51  ;;  %v415_v23 = vld [vmem:[%s3015_s1 + $0x230] sm:$0xff]  ;;  %v416_v24 = vld [vmem:[%s3015_s1 + $0x238] sm:$0xff]  ;;  %v434_v29 = vld [vmem:[%s3015_s1 + $0x2c8] sm:$0xff] }
  0x89   : > { %690 = vmatmul.mubr.f32.vlgmr.msra.gmra.mrb[0].mxu1 %v219_v50  ;;  %1803 = vmatprep.subr.bf16.mxu0 %v1802_v54  ;;  %v447_v25 = vld [vmem:[%s3015_s1 + $0x330] sm:$0xff]  ;;  %v448_v27 = vld [vmem:[%s3015_s1 + $0x338] sm:$0xff]  ;;  %v241_v30 = vld [vmem:[%s2288_s7 + $0xc0] sm:$0xff]  ;;  %v1812_v33 = vpack.c.bf16 %v416_v24, %v415_v23  ;;  %v1814_v38 = vpack.c.bf16 %v434_v29, %v433_v28 }
  0x8a   : > { %1833 = vmatpush3.bf16.msra.mxu1 %v1832_v52  ;;  %694 = vmatprep.mubr.f32.mxu1 %v228_v53  ;;  %v243_v31 = vld [vmem:[%s2288_s7 + $0xd0] sm:$0xff]  ;;  %v250_v32 = vld [vmem:[%s2288_s7 + $0x108] sm:$0xff]  ;;  %v465_v34 = vld [vmem:[%s3015_s1 + $0x3c0] sm:$0xff]  ;;  %v1844_v37 = vpack.c.bf16 %v448_v27, %v447_v25 }
  0x8b   : > { %550 = vmatmul.mubr.f32.gmra.mrb[2].mxu0 %v225_v62  ;;  %1835 = vmatprep.subr.bf16.mxu1 %v1834_v58  ;;  %v466_v35 = vld [vmem:[%s3015_s1 + $0x3c8] sm:$0xff]  ;;  %v252_v36 = vld [vmem:[%s2288_s7 + $0x118] sm:$0xff]  ;;  %v417_v39 = vld [vmem:[%s3015_s1 + $0x240] sm:$0xff] }
  0x8c   : > { %554 = vmatprep.mubr.f32.mxu0 %v234_v2  ;;  %1805 = vmatpush3.bf16.msra.mxu0 %v1804_v4  ;;  %v418_v40 = vld [vmem:[%s3015_s1 + $0x248] sm:$0xff]  ;;  %v1846_v41 = vpack.c.bf16 %v466_v35, %v465_v34  ;;  %v449_v42 = vld [vmem:[%s3015_s1 + $0x340] sm:$0xff]  ;;  %v251_v45 = vld [vmem:[%s2288_s7 + $0x110] sm:$0xff] }
  0x8d   : > { %695 = vmatmul.mubr.f32.gmra.mrb[2].mxu1 %v227_v1  ;;  %1807 = vmatprep.subr.bf16.mxu0 %v1806_v6  ;;  %v450_v43 = vld [vmem:[%s3015_s1 + $0x348] sm:$0xff]  ;;  %v249_v44 = vld [vmem:[%s2288_s7 + $0x100] sm:$0xff]  ;;  %v435_v46 = vld [vmem:[%s3015_s1 + $0x2d0] sm:$0xff]  ;;  %v1816_v49 = vpack.c.bf16 %v418_v40, %v417_v39 }
  0x8e   : > { %699 = vmatprep.mubr.f32.mxu1 %v236_v3  ;;  %1837 = vmatpush3.bf16.msra.mxu1 %v1836_v5  ;;  %v258_v47 = vld [vmem:[%s2288_s7 + $0x148] sm:$0xff]  ;;  %v260_v48 = vld [vmem:[%s2288_s7 + $0x158] sm:$0xff]  ;;  %v1848_v51 = vpack.c.bf16 %v450_v43, %v449_v42  ;;  %v419_v53 = vld [vmem:[%s3015_s1 + $0x250] sm:$0xff] }
  0x8f   : > { %555 = vmatmul.mubr.f32.gmra.mrb[4].mxu0 %v233_v14  ;;  %1839 = vmatprep.subr.bf16.mxu1 %v1838_v10  ;;  %v436_v50 = vld [vmem:[%s3015_s1 + $0x2d8] sm:$0xff]  ;;  %v467_v55 = vld [vmem:[%s3015_s1 + $0x3d0] sm:$0xff]  ;;  %v257_v58 = vld [vmem:[%s2288_s7 + $0x140] sm:$0xff] }
  0x90   : > { %559 = vmatprep.mubr.f32.mxu0 %v242_v18  ;;  %1809 = vmatpush3.bf16.msra.mxu0 %v1808_v20  ;;  %v1818_v52 = vpack.c.bf16 %v436_v50, %v435_v46  ;;  %v420_v54 = vld [vmem:[%s3015_s1 + $0x258] sm:$0xff]  ;;  %v451_v57 = vld [vmem:[%s3015_s1 + $0x350] sm:$0xff]  ;;  %v266_v62 = vld [vmem:[%s2288_s7 + $0x188] sm:$0xff] }
  0x91   : > { %700 = vmatmul.mubr.f32.gmra.mrb[4].mxu1 %v235_v17  ;;  %1811 = vmatprep.subr.bf16.mxu0 %v1810_v22  ;;  %v468_v56 = vld [vmem:[%s3015_s1 + $0x3d8] sm:$0xff]  ;;  %v259_v61 = vld [vmem:[%s2288_s7 + $0x150] sm:$0xff]  ;;  %v1820_v63 = vpack.c.bf16 %v420_v54, %v419_v53  ;;  %v437_v2 = vld [vmem:[%s3015_s1 + $0x2e0] sm:$0xff] }
  0x92   : > { %704 = vmatprep.mubr.f32.mxu1 %v244_v19  ;;  %1841 = vmatpush3.bf16.msra.mxu1 %v1840_v21  ;;  %v1850_v59 = vpack.c.bf16 %v468_v56, %v467_v55  ;;  %v452_v60 = vld [vmem:[%s3015_s1 + $0x358] sm:$0xff]  ;;  %v438_v3 = vld [vmem:[%s3015_s1 + $0x2e8] sm:$0xff]  ;;  %v265_v4 = vld [vmem:[%s2288_s7 + $0x180] sm:$0xff] }
  0x93   : > { %560 = vmatmul.mubr.f32.gmra.mrb[6].mxu0 %v241_v30  ;;  %1843 = vmatprep.subr.bf16.mxu1 %v1842_v26  ;;  %v268_v0 = vld [vmem:[%s2288_s7 + $0x198] sm:$0xff]  ;;  %v1852_v1 = vpack.c.bf16 %v452_v60, %v451_v57  ;;  %v1822_v5 = vpack.c.bf16 %v438_v3, %v437_v2  ;;  %v421_v6 = vld [vmem:[%s3015_s1 + $0x260] sm:$0xff]  ;;  %v422_v7 = vld [vmem:[%s3015_s1 + $0x268] sm:$0xff] }
  0x94   : > { %564 = vmatprep.mubr.f32.mxu0 %v250_v32  ;;  %1813 = vmatpush3.bf16.msra.mxu0 %v1812_v33  ;;  %v267_v8 = vld [vmem:[%s2288_s7 + $0x190] sm:$0xff]  ;;  %v469_v9 = vld [vmem:[%s3015_s1 + $0x3e0] sm:$0xff]  ;;  %v470_v10 = vld [vmem:[%s3015_s1 + $0x3e8] sm:$0xff]  ;;  %v1824_v12 = vpack.c.bf16 %v422_v7, %v421_v6 }
  0x95   : > { %705 = vmatmul.mubr.f32.gmra.mrb[6].mxu1 %v243_v31  ;;  %1815 = vmatprep.subr.bf16.mxu0 %v1814_v38  ;;  %v274_v11 = vld [vmem:[%s2288_s7 + $0x1c8] sm:$0xff]  ;;  %v1854_v13 = vpack.c.bf16 %v470_v10, %v469_v9  ;;  %v453_v14 = vld [vmem:[%s3015_s1 + $0x360] sm:$0xff]  ;;  %v276_v16 = vld [vmem:[%s2288_s7 + $0x1d8] sm:$0xff] }
  0x96   : > { %709 = vmatprep.mubr.f32.mxu1 %v252_v36  ;;  %1845 = vmatpush3.bf16.msra.mxu1 %v1844_v37  ;;  %v454_v15 = vld [vmem:[%s3015_s1 + $0x368] sm:$0xff]  ;;  %v273_v18 = vld [vmem:[%s2288_s7 + $0x1c0] sm:$0xff]  ;;  %v439_v19 = vld [vmem:[%s3015_s1 + $0x2f0] sm:$0xff] }
  0x97   : > { %565 = vmatmul.mubr.f32.gmra.mrb[8].mxu0 %v249_v44  ;;  %1847 = vmatprep.subr.bf16.mxu1 %v1846_v41  ;;  %v1856_v17 = vpack.c.bf16 %v454_v15, %v453_v14  ;;  %v440_v20 = vld [vmem:[%s3015_s1 + $0x2f8] sm:$0xff]  ;;  %v275_v21 = vld [vmem:[%s2288_s7 + $0x1d0] sm:$0xff]  ;;  %v282_v25 = vld [vmem:[%s2288_s7 + $0x208] sm:$0xff] }
  0x98   : > { %569 = vmatprep.mubr.f32.mxu0 %v258_v47  ;;  %1817 = vmatpush3.bf16.msra.mxu0 %v1816_v49  ;;  %v1826_v22 = vpack.c.bf16 %v440_v20, %v439_v19  ;;  %v423_v23 = vld [vmem:[%s3015_s1 + $0x270] sm:$0xff]  ;;  %v424_v24 = vld [vmem:[%s3015_s1 + $0x278] sm:$0xff]  ;;  %v281_v34 = vld [vmem:[%s2288_s7 + $0x200] sm:$0xff] }
  0x99   : > { %710 = vmatmul.mubr.f32.gmra.mrb[8].mxu1 %v251_v45  ;;  %1819 = vmatprep.subr.bf16.mxu0 %v1818_v52  ;;  %v1828_v26 = vpack.c.bf16 %v424_v24, %v423_v23  ;;  %v471_v27 = vld [vmem:[%s3015_s1 + $0x3f0] sm:$0xff]  ;;  %v472_v28 = vld [vmem:[%s3015_s1 + $0x3f8] sm:$0xff]  ;;  %v290_v36 = vld [vmem:[%s2288_s7 + $0x248] sm:$0xff] }
  0x9a   : > { %714 = vmatprep.mubr.f32.mxu1 %v260_v48  ;;  %1849 = vmatpush3.bf16.msra.mxu1 %v1848_v51  ;;  %v284_v29 = vld [vmem:[%s2288_s7 + $0x218] sm:$0xff]  ;;  %v1858_v30 = vpack.c.bf16 %v472_v28, %v471_v27  ;;  %v455_v31 = vld [vmem:[%s3015_s1 + $0x370] sm:$0xff]  ;;  %v289_v38 = vld [vmem:[%s2288_s7 + $0x240] sm:$0xff] }
  0x9b   : > { %570 = vmatmul.mubr.f32.gmra.mrb[10].mxu0 %v257_v58  ;;  %1851 = vmatprep.subr.bf16.mxu1 %v1850_v59  ;;  %v456_v32 = vld [vmem:[%s3015_s1 + $0x378] sm:$0xff]  ;;  %v283_v35 = vld [vmem:[%s2288_s7 + $0x210] sm:$0xff]  ;;  %v298_v40 = vld [vmem:[%s2288_s7 + $0x288] sm:$0xff] }
  0x9c   : > { %574 = vmatprep.mubr.f32.mxu0 %v266_v62  ;;  %1821 = vmatpush3.bf16.msra.mxu0 %v1820_v63  ;;  %v1860_v33 = vpack.c.bf16 %v456_v32, %v455_v31  ;;  %v292_v37 = vld [vmem:[%s2288_s7 + $0x258] sm:$0xff]  ;;  %v291_v39 = vld [vmem:[%s2288_s7 + $0x250] sm:$0xff]  ;;  %v297_v42 = vld [vmem:[%s2288_s7 + $0x280] sm:$0xff] }
  0x9d   : > { %715 = vmatmul.mubr.f32.gmra.mrb[10].mxu1 %v259_v61  ;;  %1823 = vmatprep.subr.bf16.mxu0 %v1822_v5  ;;  %v300_v41 = vld [vmem:[%s2288_s7 + $0x298] sm:$0xff]  ;;  %v299_v43 = vld [vmem:[%s2288_s7 + $0x290] sm:$0xff]  ;;  %v306_v44 = vld [vmem:[%s2288_s7 + $0x2c8] sm:$0xff] }
  0x9e   : > { %719 = vmatprep.mubr.f32.mxu1 %v268_v0  ;;  %1853 = vmatpush3.bf16.msra.mxu1 %v1852_v1  ;;  %v308_v45 = vld [vmem:[%s2288_s7 + $0x2d8] sm:$0xff]  ;;  %v305_v46 = vld [vmem:[%s2288_s7 + $0x2c0] sm:$0xff]  ;;  %v307_v47 = vld [vmem:[%s2288_s7 + $0x2d0] sm:$0xff] }
  0x9f   : > { %575 = vmatmul.mubr.f32.gmra.mrb[12].mxu0 %v265_v4  ;;  %1855 = vmatprep.subr.bf16.mxu1 %v1854_v13  ;;  %v314_v48 = vld [vmem:[%s2288_s7 + $0x308] sm:$0xff]  ;;  %v316_v49 = vld [vmem:[%s2288_s7 + $0x318] sm:$0xff]  ;;  %v313_v50 = vld [vmem:[%s2288_s7 + $0x300] sm:$0xff] }
  0xa0   : > { %579 = vmatprep.mubr.f32.mxu0 %v274_v11  ;;  %1825 = vmatpush3.bf16.msra.mxu0 %v1824_v12  ;;  %v315_v51 = vld [vmem:[%s2288_s7 + $0x310] sm:$0xff]  ;;  %v322_v52 = vld [vmem:[%s2288_s7 + $0x348] sm:$0xff]  ;;  %v324_v53 = vld [vmem:[%s2288_s7 + $0x358] sm:$0xff] }
  0xa1   : > { %720 = vmatmul.mubr.f32.gmra.mrb[12].mxu1 %v267_v8  ;;  %1827 = vmatprep.subr.bf16.mxu0 %v1826_v22  ;;  %v321_v54 = vld [vmem:[%s2288_s7 + $0x340] sm:$0xff]  ;;  %v323_v55 = vld [vmem:[%s2288_s7 + $0x350] sm:$0xff]  ;;  %v330_v56 = vld [vmem:[%s2288_s7 + $0x388] sm:$0xff] }
  0xa2   : > { %724 = vmatprep.mubr.f32.mxu1 %v276_v16  ;;  %1857 = vmatpush3.bf16.msra.mxu1 %v1856_v17  ;;  %v332_v57 = vld [vmem:[%s2288_s7 + $0x398] sm:$0xff]  ;;  %v329_v58 = vld [vmem:[%s2288_s7 + $0x380] sm:$0xff]  ;;  %v331_v59 = vld [vmem:[%s2288_s7 + $0x390] sm:$0xff] }
  0xa3   : > { %580 = vmatmul.mubr.f32.gmra.mrb[14].mxu0 %v273_v18  ;;  %1859 = vmatprep.subr.bf16.mxu1 %v1858_v30  ;;  %v338_v60 = vld [vmem:[%s2288_s7 + $0x3c8] sm:$0xff]  ;;  %v340_v61 = vld [vmem:[%s2288_s7 + $0x3d8] sm:$0xff]  ;;  %v337_v62 = vld [vmem:[%s2288_s7 + $0x3c0] sm:$0xff] }
  0xa4   : > { %584 = vmatprep.mubr.f32.mxu0 %v282_v25  ;;  %1829 = vmatpush3.bf16.msra.mxu0 %v1828_v26  ;;  %v339_v63 = vld [vmem:[%s2288_s7 + $0x3d0] sm:$0xff]  ;;  %v222_v0 = vld [vmem:[%s2288_s7 + $0x28] sm:$0xff]  ;;  %v224_v1 = vld [vmem:[%s2288_s7 + $0x38] sm:$0xff] }
  0xa5   : > { %725 = vmatmul.mubr.f32.gmra.mrb[14].mxu1 %v275_v21  ;;  %v221_v2 = vld [vmem:[%s2288_s7 + $0x20] sm:$0xff]  ;;  %v223_v3 = vld [vmem:[%s2288_s7 + $0x30] sm:$0xff]  ;;  %v230_v4 = vld [vmem:[%s2288_s7 + $0x68] sm:$0xff] }
  0xa6   : > { %729 = vmatprep.mubr.f32.mxu1 %v284_v29  ;;  %1861 = vmatpush3.bf16.msra.mxu1 %v1860_v33  ;;  %v232_v5 = vld [vmem:[%s2288_s7 + $0x78] sm:$0xff]  ;;  %v229_v6 = vld [vmem:[%s2288_s7 + $0x60] sm:$0xff]  ;;  %v231_v7 = vld [vmem:[%s2288_s7 + $0x70] sm:$0xff] }
  0xa7   : > { %585 = vmatmul.mubr.f32.gmra.mrb[16].mxu0 %v281_v34  ;;  %v238_v8 = vld [vmem:[%s2288_s7 + $0xa8] sm:$0xff]  ;;  %v240_v9 = vld [vmem:[%s2288_s7 + $0xb8] sm:$0xff]  ;;  %v237_v10 = vld [vmem:[%s2288_s7 + $0xa0] sm:$0xff] }
  0xa8   : > { %589 = vmatprep.mubr.f32.mxu0 %v290_v36  ;;  %v239_v11 = vld [vmem:[%s2288_s7 + $0xb0] sm:$0xff]  ;;  %v246_v12 = vld [vmem:[%s2288_s7 + $0xe8] sm:$0xff]  ;;  %v248_v13 = vld [vmem:[%s2288_s7 + $0xf8] sm:$0xff] }
  0xa9   : > { %730 = vmatmul.mubr.f32.gmra.mrb[16].mxu1 %v283_v35  ;;  %v245_v14 = vld [vmem:[%s2288_s7 + $0xe0] sm:$0xff]  ;;  %v247_v15 = vld [vmem:[%s2288_s7 + $0xf0] sm:$0xff]  ;;  %v254_v16 = vld [vmem:[%s2288_s7 + $0x128] sm:$0xff] }
  0xaa   : > { %734 = vmatprep.mubr.f32.mxu1 %v292_v37  ;;  %v256_v17 = vld [vmem:[%s2288_s7 + $0x138] sm:$0xff]  ;;  %v253_v18 = vld [vmem:[%s2288_s7 + $0x120] sm:$0xff]  ;;  %v255_v19 = vld [vmem:[%s2288_s7 + $0x130] sm:$0xff] }
  0xab   : > { %590 = vmatmul.mubr.f32.gmra.mrb[18].mxu0 %v289_v38  ;;  %v262_v20 = vld [vmem:[%s2288_s7 + $0x168] sm:$0xff]  ;;  %v264_v21 = vld [vmem:[%s2288_s7 + $0x178] sm:$0xff]  ;;  %v261_v22 = vld [vmem:[%s2288_s7 + $0x160] sm:$0xff] }
  0xac   : > { %594 = vmatprep.mubr.f32.mxu0 %v298_v40  ;;  %v263_v23 = vld [vmem:[%s2288_s7 + $0x170] sm:$0xff]  ;;  %v270_v24 = vld [vmem:[%s2288_s7 + $0x1a8] sm:$0xff]  ;;  %v272_v25 = vld [vmem:[%s2288_s7 + $0x1b8] sm:$0xff] }
  0xad   : > { %735 = vmatmul.mubr.f32.gmra.mrb[18].mxu1 %v291_v39  ;;  %v269_v26 = vld [vmem:[%s2288_s7 + $0x1a0] sm:$0xff]  ;;  %v271_v27 = vld [vmem:[%s2288_s7 + $0x1b0] sm:$0xff]  ;;  %v278_v28 = vld [vmem:[%s2288_s7 + $0x1e8] sm:$0xff] }
  0xae   : > { %739 = vmatprep.mubr.f32.mxu1 %v300_v41  ;;  %v280_v29 = vld [vmem:[%s2288_s7 + $0x1f8] sm:$0xff]  ;;  %v277_v30 = vld [vmem:[%s2288_s7 + $0x1e0] sm:$0xff]  ;;  %v279_v31 = vld [vmem:[%s2288_s7 + $0x1f0] sm:$0xff] }
  0xaf   : > { %595 = vmatmul.mubr.f32.gmra.mrb[20].mxu0 %v297_v42  ;;  %v286_v32 = vld [vmem:[%s2288_s7 + $0x228] sm:$0xff]  ;;  %v288_v33 = vld [vmem:[%s2288_s7 + $0x238] sm:$0xff]  ;;  %v285_v34 = vld [vmem:[%s2288_s7 + $0x220] sm:$0xff] }
  0xb0   : > { %599 = vmatprep.mubr.f32.mxu0 %v306_v44  ;;  %v287_v35 = vld [vmem:[%s2288_s7 + $0x230] sm:$0xff]  ;;  %v294_v36 = vld [vmem:[%s2288_s7 + $0x268] sm:$0xff]  ;;  %v296_v37 = vld [vmem:[%s2288_s7 + $0x278] sm:$0xff] }
  0xb1   : > { %740 = vmatmul.mubr.f32.gmra.mrb[20].mxu1 %v299_v43  ;;  %v293_v38 = vld [vmem:[%s2288_s7 + $0x260] sm:$0xff]  ;;  %v295_v39 = vld [vmem:[%s2288_s7 + $0x270] sm:$0xff]  ;;  %v302_v40 = vld [vmem:[%s2288_s7 + $0x2a8] sm:$0xff] }
  0xb2   : > { %744 = vmatprep.mubr.f32.mxu1 %v308_v45  ;;  %v304_v41 = vld [vmem:[%s2288_s7 + $0x2b8] sm:$0xff]  ;;  %v301_v42 = vld [vmem:[%s2288_s7 + $0x2a0] sm:$0xff]  ;;  %v303_v43 = vld [vmem:[%s2288_s7 + $0x2b0] sm:$0xff] }
  0xb3   : > { %600 = vmatmul.mubr.f32.gmra.mrb[22].mxu0 %v305_v46  ;;  %v310_v44 = vld [vmem:[%s2288_s7 + $0x2e8] sm:$0xff]  ;;  %v312_v45 = vld [vmem:[%s2288_s7 + $0x2f8] sm:$0xff]  ;;  %v309_v46 = vld [vmem:[%s2288_s7 + $0x2e0] sm:$0xff] }
  0xb4   : > { %604 = vmatprep.mubr.f32.mxu0 %v314_v48  ;;  %v318_v48 = vld [vmem:[%s2288_s7 + $0x328] sm:$0xff] }
  0xb5   : > { %745 = vmatmul.mubr.f32.gmra.mrb[22].mxu1 %v307_v47  ;;  %v311_v47 = vld [vmem:[%s2288_s7 + $0x2f0] sm:$0xff] }
  0xb6   : > { %749 = vmatprep.mubr.f32.mxu1 %v316_v49  ;;  %v320_v49 = vld [vmem:[%s2288_s7 + $0x338] sm:$0xff] }
  0xb7   : > { %605 = vmatmul.mubr.f32.gmra.mrb[24].mxu0 %v313_v50  ;;  %v317_v50 = vld [vmem:[%s2288_s7 + $0x320] sm:$0xff] }
  0xb8   : > { %609 = vmatprep.mubr.f32.mxu0 %v322_v52  ;;  %v326_v52 = vld [vmem:[%s2288_s7 + $0x368] sm:$0xff] }
  0xb9   : > { %750 = vmatmul.mubr.f32.gmra.mrb[24].mxu1 %v315_v51  ;;  %v319_v51 = vld [vmem:[%s2288_s7 + $0x330] sm:$0xff] }
  0xba   : > { %754 = vmatprep.mubr.f32.mxu1 %v324_v53  ;;  %v328_v53 = vld [vmem:[%s2288_s7 + $0x378] sm:$0xff] }
  0xbb   : > { %610 = vmatmul.mubr.f32.gmra.mrb[26].mxu0 %v321_v54  ;;  %v325_v54 = vld [vmem:[%s2288_s7 + $0x360] sm:$0xff] }
  0xbc   : > { %614 = vmatprep.mubr.f32.mxu0 %v330_v56  ;;  %v334_v56 = vld [vmem:[%s2288_s7 + $0x3a8] sm:$0xff] }
  0xbd   : > { %755 = vmatmul.mubr.f32.gmra.mrb[26].mxu1 %v323_v55  ;;  %v327_v55 = vld [vmem:[%s2288_s7 + $0x370] sm:$0xff] }
  0xbe   : > { %759 = vmatprep.mubr.f32.mxu1 %v332_v57  ;;  %v336_v57 = vld [vmem:[%s2288_s7 + $0x3b8] sm:$0xff] }
  0xbf   : > { %615 = vmatmul.mubr.f32.gmra.mrb[28].mxu0 %v329_v58  ;;  %v333_v58 = vld [vmem:[%s2288_s7 + $0x3a0] sm:$0xff] }
  0xc0   : > { %619 = vmatprep.mubr.f32.mxu0 %v338_v60  ;;  %v342_v60 = vld [vmem:[%s2288_s7 + $0x3e8] sm:$0xff] }
  0xc1   : > { %760 = vmatmul.mubr.f32.gmra.mrb[28].mxu1 %v331_v59  ;;  %v335_v59 = vld [vmem:[%s2288_s7 + $0x3b0] sm:$0xff] }
  0xc2   : > { %764 = vmatprep.mubr.f32.mxu1 %v340_v61  ;;  %v344_v61 = vld [vmem:[%s2288_s7 + $0x3f8] sm:$0xff] }
  0xc3   : > { %620 = vmatmul.mubr.f32.gmra.mrb[30].mxu0 %v337_v62  ;;  %v341_v62 = vld [vmem:[%s2288_s7 + $0x3e0] sm:$0xff] }
  0xc4   : > { %834 = vmatprep.mubr.f32.mxu0 %v222_v0 }
  0xc5   : > { %765 = vmatmul.mubr.f32.gmra.mrb[30].mxu1 %v339_v63  ;;  %v343_v63 = vld [vmem:[%s2288_s7 + $0x3f0] sm:$0xff]  ;;  %s1389_s7 = sshll.u32 %s2284_s21, 7  ;;  %s1392_s21 = sshll.u32 (%p3031_p6), %s2175_s16, 4 }
  0xc6   : > { %979 = vmatprep.mubr.f32.mxu1 %v224_v1  ;;  %v2810_v1 = vld [vmem:[#allocation4] ss:$0 sm:$0xff]  ;;  %s2862_s10 = scalar_lea.vmem [#allocation6], %s1389_s7   ;;  %s1085_s12 = ssub.s32 (%p3031_p6), 38, %s1392_s21 }
  0xc7   : > { %835 = vmatmul.mubr.f32.vlgmr.msra.gmra.mrb[32].mxu0 %v221_v2  ;;  %p1086_p7 = scmp.lt.s32.totalorder (%p3031_p6), %s1085_s12, 16 }
  0xc8   : > { %839 = vmatprep.mubr.f32.mxu0 %v230_v4 }
  0xc9   : > { %980 = vmatmul.mubr.f32.vlgmr.msra.gmra.mrb[32].mxu1 %v223_v3 }
  0xca   : > { %984 = vmatprep.mubr.f32.mxu1 %v232_v5 }
  0xcb   : > { %840 = vmatmul.mubr.f32.gmra.mrb[34].mxu0 %v229_v6 }
  0xcc   : > { %844 = vmatprep.mubr.f32.mxu0 %v238_v8 }
  0xcd   : > { %985 = vmatmul.mubr.f32.gmra.mrb[34].mxu1 %v231_v7 }
  0xce   : > { %989 = vmatprep.mubr.f32.mxu1 %v240_v9 }
  0xcf   : > { %845 = vmatmul.mubr.f32.gmra.mrb[36].mxu0 %v237_v10 }
  0xd0   : > { %849 = vmatprep.mubr.f32.mxu0 %v246_v12 }
  0xd1   : > { %990 = vmatmul.mubr.f32.gmra.mrb[36].mxu1 %v239_v11 }
  0xd2   : > { %994 = vmatprep.mubr.f32.mxu1 %v248_v13 }
  0xd3   : > { %850 = vmatmul.mubr.f32.gmra.mrb[38].mxu0 %v245_v14 }
  0xd4   : > { %854 = vmatprep.mubr.f32.mxu0 %v254_v16 }
  0xd5   : > { %995 = vmatmul.mubr.f32.gmra.mrb[38].mxu1 %v247_v15 }
  0xd6   : > { %999 = vmatprep.mubr.f32.mxu1 %v256_v17 }
  0xd7   : > { %855 = vmatmul.mubr.f32.gmra.mrb[40].mxu0 %v253_v18 }
  0xd8   : > { %859 = vmatprep.mubr.f32.mxu0 %v262_v20 }
  0xd9   : > { %1000 = vmatmul.mubr.f32.gmra.mrb[40].mxu1 %v255_v19 }
  0xda   : > { %1004 = vmatprep.mubr.f32.mxu1 %v264_v21 }
  0xdb   : > { %860 = vmatmul.mubr.f32.gmra.mrb[42].mxu0 %v261_v22 }
  0xdc   : > { %864 = vmatprep.mubr.f32.mxu0 %v270_v24 }
  0xdd   : > { %1005 = vmatmul.mubr.f32.gmra.mrb[42].mxu1 %v263_v23 }
  0xde   : > { %1009 = vmatprep.mubr.f32.mxu1 %v272_v25 }
  0xdf   : > { %865 = vmatmul.mubr.f32.gmra.mrb[44].mxu0 %v269_v26 }
  0xe0   : > { %869 = vmatprep.mubr.f32.mxu0 %v278_v28 }
  0xe1   : > { %1010 = vmatmul.mubr.f32.gmra.mrb[44].mxu1 %v271_v27 }
  0xe2   : > { %1014 = vmatprep.mubr.f32.mxu1 %v280_v29 }
  0xe3   : > { %870 = vmatmul.mubr.f32.gmra.mrb[46].mxu0 %v277_v30 }
  0xe4   : > { %874 = vmatprep.mubr.f32.mxu0 %v286_v32 }
  0xe5   : > { %1015 = vmatmul.mubr.f32.gmra.mrb[46].mxu1 %v279_v31 }
  0xe6   : > { %1019 = vmatprep.mubr.f32.mxu1 %v288_v33 }
  0xe7   : > { %875 = vmatmul.mubr.f32.gmra.mrb[48].mxu0 %v285_v34 }
  0xe8   : > { %879 = vmatprep.mubr.f32.mxu0 %v294_v36 }
  0xe9   : > { %1020 = vmatmul.mubr.f32.gmra.mrb[48].mxu1 %v287_v35 }
  0xea   : > { %1024 = vmatprep.mubr.f32.mxu1 %v296_v37 }
  0xeb   : > { %880 = vmatmul.mubr.f32.gmra.mrb[50].mxu0 %v293_v38 }
  0xec   : > { %884 = vmatprep.mubr.f32.mxu0 %v302_v40 }
  0xed   : > { %1025 = vmatmul.mubr.f32.gmra.mrb[50].mxu1 %v295_v39 }
  0xee   : > { %1029 = vmatprep.mubr.f32.mxu1 %v304_v41 }
  0xef   : > { %885 = vmatmul.mubr.f32.gmra.mrb[52].mxu0 %v301_v42 }
  0xf0   : > { %889 = vmatprep.mubr.f32.mxu0 %v310_v44 }
  0xf1   : > { %1030 = vmatmul.mubr.f32.gmra.mrb[52].mxu1 %v303_v43 }
  0xf2   : > { %1034 = vmatprep.mubr.f32.mxu1 %v312_v45 }
  0xf3   : > { %890 = vmatmul.mubr.f32.gmra.mrb[54].mxu0 %v309_v46 }
  0xf4   : > { %894 = vmatprep.mubr.f32.mxu0 %v318_v48 }
  0xf5   : > { %1035 = vmatmul.mubr.f32.gmra.mrb[54].mxu1 %v311_v47 }
  0xf6   : > { %1039 = vmatprep.mubr.f32.mxu1 %v320_v49 }
  0xf7   : > { %895 = vmatmul.mubr.f32.gmra.mrb[56].mxu0 %v317_v50 }
  0xf8   : > { %899 = vmatprep.mubr.f32.mxu0 %v326_v52 }
  0xf9   : > { %1040 = vmatmul.mubr.f32.gmra.mrb[56].mxu1 %v319_v51 }
  0xfa   : > { %1044 = vmatprep.mubr.f32.mxu1 %v328_v53 }
  0xfb   : > { %900 = vmatmul.mubr.f32.gmra.mrb[58].mxu0 %v325_v54 }
  0xfc   : > { %904 = vmatprep.mubr.f32.mxu0 %v334_v56 }
  0xfd   : > { %1045 = vmatmul.mubr.f32.gmra.mrb[58].mxu1 %v327_v55 }
  0xfe   : > { %1049 = vmatprep.mubr.f32.mxu1 %v336_v57 }
  0xff   : > { %905 = vmatmul.mubr.f32.gmra.mrb[60].mxu0 %v333_v58 }
 0x100   : > { %909 = vmatprep.mubr.f32.mxu0 %v342_v60 }
 0x101   : > { %1050 = vmatmul.mubr.f32.gmra.mrb[60].mxu1 %v335_v59 }
 0x102   : > { %1054 = vmatprep.mubr.f32.mxu1 %v344_v61 }
 0x103   : > { %910 = vmatmul.mubr.f32.gmra.mrb[62].mxu0 %v341_v62 }
 0x105   : > { %1055 = vmatmul.mubr.f32.gmra.mrb[62].mxu1 %v343_v63 }
 0x15a   : > { %v1446_v0 = vpop.f32.mrb[0].mxu0 }
 0x15b   : > { %v1447_v2 = vpop.f32.mrb[1].mxu0 }
 0x15c   : > { %v1526_v3 = vpop.f32.mrb[0].mxu1  ;;  %v1448_v4 = vadd.f32 %v1447_v2, %v1446_v0 }
 0x15d   : > { %v1527_v5 = vpop.f32.mrb[1].mxu1 }
 0x15e   : > { %v1528_v6 = vadd.f32 %v1527_v5, %v1526_v3  ;;  %v547_v7 = vadd.f32 %v1448_v4, %v2810_v1  ;;  %v1449_v8 = vpop.f32.mrb[2].mxu0 }
 0x15f   : > { %v1450_v9 = vpop.f32.mrb[3].mxu0 }
 0x160   : > { %v1529_v10 = vpop.f32.mrb[2].mxu1  ;;  %v2813_v11 = vadd.f32 %v1528_v6, %v547_v7  ;;  %v1451_v12 = vadd.f32 %v1450_v9, %v1449_v8 }
 0x161   : > { %v1530_v13 = vpop.f32.mrb[3].mxu1 }
 0x162   : > { %v1531_v14 = vadd.f32 %v1530_v13, %v1529_v10  ;;  %v552_v15 = vadd.f32 %v1451_v12, %v2810_v1  ;;  %v1452_v16 = vpop.f32.mrb[4].mxu0 }
 0x163   : > { %v1453_v17 = vpop.f32.mrb[5].mxu0 }
 0x164   : > { %v1532_v18 = vpop.f32.mrb[4].mxu1  ;;  %v2816_v19 = vadd.f32 %v1531_v14, %v552_v15  ;;  %v1454_v20 = vadd.f32 %v1453_v17, %v1452_v16 }
 0x165   : > { %v1533_v21 = vpop.f32.mrb[5].mxu1 }
 0x166   : > { %v1534_v22 = vadd.f32 %v1533_v21, %v1532_v18  ;;  %v557_v23 = vadd.f32 %v1454_v20, %v2810_v1  ;;  %v1455_v24 = vpop.f32.mrb[6].mxu0 }
 0x167   : > { %v1456_v25 = vpop.f32.mrb[7].mxu0 }
 0x168   : > { %v1535_v26 = vpop.f32.mrb[6].mxu1  ;;  %v2819_v27 = vadd.f32 %v1534_v22, %v557_v23  ;;  %v1457_v28 = vadd.f32 %v1456_v25, %v1455_v24 }
 0x169   : > { %v1536_v29 = vpop.f32.mrb[7].mxu1 }
 0x16a   : > { %v1537_v30 = vadd.f32 %v1536_v29, %v1535_v26  ;;  %v562_v31 = vadd.f32 %v1457_v28, %v2810_v1  ;;  %v1458_v32 = vpop.f32.mrb[8].mxu0 }
 0x16b   : > { %v1459_v33 = vpop.f32.mrb[9].mxu0 }
 0x16c   : > { %v1538_v34 = vpop.f32.mrb[8].mxu1  ;;  %v2822_v35 = vadd.f32 %v1537_v30, %v562_v31  ;;  %v1460_v36 = vadd.f32 %v1459_v33, %v1458_v32 }
 0x16d   : > { %v1539_v37 = vpop.f32.mrb[9].mxu1 }
 0x16e   : > { %v1540_v38 = vadd.f32 %v1539_v37, %v1538_v34  ;;  %v567_v39 = vadd.f32 %v1460_v36, %v2810_v1  ;;  %v1461_v40 = vpop.f32.mrb[10].mxu0 }
 0x16f   : > { %v1462_v41 = vpop.f32.mrb[11].mxu0 }
 0x170   : > { %v1541_v42 = vpop.f32.mrb[10].mxu1  ;;  %v2825_v43 = vadd.f32 %v1540_v38, %v567_v39  ;;  %v1463_v44 = vadd.f32 %v1462_v41, %v1461_v40 }
 0x171   : > { %v1542_v45 = vpop.f32.mrb[11].mxu1 }
 0x172   : > { %v1543_v46 = vadd.f32 %v1542_v45, %v1541_v42  ;;  %v572_v47 = vadd.f32 %v1463_v44, %v2810_v1  ;;  %v1464_v48 = vpop.f32.mrb[12].mxu0 }
 0x173   : > { %v1465_v49 = vpop.f32.mrb[13].mxu0 }
 0x174   : > { %v1544_v50 = vpop.f32.mrb[12].mxu1  ;;  %v2828_v51 = vadd.f32 %v1543_v46, %v572_v47  ;;  %v1466_v52 = vadd.f32 %v1465_v49, %v1464_v48 }
 0x175   : > { %v1545_v53 = vpop.f32.mrb[13].mxu1 }
 0x176   : > { %v1546_v54 = vadd.f32 %v1545_v53, %v1544_v50  ;;  %v577_v55 = vadd.f32 %v1466_v52, %v2810_v1  ;;  %v1467_v56 = vpop.f32.mrb[14].mxu0 }
 0x177   : > { %v1468_v57 = vpop.f32.mrb[15].mxu0 }
 0x178   : > { %v1547_v58 = vpop.f32.mrb[14].mxu1  ;;  %v2831_v59 = vadd.f32 %v1546_v54, %v577_v55  ;;  %v1469_v60 = vadd.f32 %v1468_v57, %v1467_v56 }
 0x179   : > { %v1548_v61 = vpop.f32.mrb[15].mxu1 }
 0x17a   : > { %v1549_v62 = vadd.f32 %v1548_v61, %v1547_v58  ;;  %v582_v63 = vadd.f32 %v1469_v60, %v2810_v1  ;;  %v1470_v0 = vpop.f32.mrb[16].mxu0 }
 0x17b   : > { %v1471_v2 = vpop.f32.mrb[17].mxu0 }
 0x17c   : > { %v1550_v3 = vpop.f32.mrb[16].mxu1  ;;  %v2834_v4 = vadd.f32 %v1549_v62, %v582_v63  ;;  %v1472_v5 = vadd.f32 %v1471_v2, %v1470_v0 }
 0x17d   : > { %v1551_v6 = vpop.f32.mrb[17].mxu1 }
 0x17e   : > { %v1552_v7 = vadd.f32 %v1551_v6, %v1550_v3  ;;  %v587_v8 = vadd.f32 %v1472_v5, %v2810_v1  ;;  %v1473_v9 = vpop.f32.mrb[18].mxu0 }
 0x17f   : > { %v1474_v10 = vpop.f32.mrb[19].mxu0 }
 0x180   : > { %v1553_v12 = vpop.f32.mrb[18].mxu1  ;;  %v2837_v13 = vadd.f32 %v1552_v7, %v587_v8  ;;  %v1475_v14 = vadd.f32 %v1474_v10, %v1473_v9 }
 0x181   : > { %v1554_v15 = vpop.f32.mrb[19].mxu1 }
 0x182   : > { %v1555_v16 = vadd.f32 %v1554_v15, %v1553_v12  ;;  %v592_v17 = vadd.f32 %v1475_v14, %v2810_v1  ;;  %v1476_v18 = vpop.f32.mrb[20].mxu0 }
 0x183   : > { %v1477_v20 = vpop.f32.mrb[21].mxu0 }
 0x184   : > { %v1556_v21 = vpop.f32.mrb[20].mxu1  ;;  %v2840_v22 = vadd.f32 %v1555_v16, %v592_v17  ;;  %v1478_v23 = vadd.f32 %v1477_v20, %v1476_v18 }
 0x185   : > { %v1557_v24 = vpop.f32.mrb[21].mxu1 }
 0x186   : > { %v1558_v25 = vadd.f32 %v1557_v24, %v1556_v21  ;;  %v597_v26 = vadd.f32 %v1478_v23, %v2810_v1  ;;  %v1479_v28 = vpop.f32.mrb[22].mxu0 }
 0x187   : > { %v1480_v29 = vpop.f32.mrb[23].mxu0 }
 0x188   : > { %v1559_v30 = vpop.f32.mrb[22].mxu1  ;;  %v2843_v31 = vadd.f32 %v1558_v25, %v597_v26  ;;  %v1481_v32 = vadd.f32 %v1480_v29, %v1479_v28 }
 0x189   : > { %v1560_v33 = vpop.f32.mrb[23].mxu1 }
 0x18a   : > { %v1561_v34 = vadd.f32 %v1560_v33, %v1559_v30  ;;  %v602_v36 = vadd.f32 %v1481_v32, %v2810_v1  ;;  %v1482_v37 = vpop.f32.mrb[24].mxu0 }
 0x18b   : > { %v1483_v38 = vpop.f32.mrb[25].mxu0 }
 0x18c   : > { %v1562_v39 = vpop.f32.mrb[24].mxu1  ;;  %v2846_v40 = vadd.f32 %v1561_v34, %v602_v36  ;;  %v1484_v41 = vadd.f32 %v1483_v38, %v1482_v37 }
 0x18d   : > { %v1563_v42 = vpop.f32.mrb[25].mxu1 }
 0x18e   : > { %v1564_v44 = vadd.f32 %v1563_v42, %v1562_v39  ;;  %v607_v45 = vadd.f32 %v1484_v41, %v2810_v1  ;;  %v1485_v46 = vpop.f32.mrb[26].mxu0 }
 0x18f   : > { %v1486_v47 = vpop.f32.mrb[27].mxu0 }
 0x190   : > { %v1565_v48 = vpop.f32.mrb[26].mxu1  ;;  %v2849_v49 = vadd.f32 %v1564_v44, %v607_v45  ;;  %v1487_v50 = vadd.f32 %v1486_v47, %v1485_v46 }
 0x191   : > { %v1566_v52 = vpop.f32.mrb[27].mxu1 }
 0x192   : > { %v1567_v53 = vadd.f32 %v1566_v52, %v1565_v48  ;;  %v612_v54 = vadd.f32 %v1487_v50, %v2810_v1  ;;  %v1488_v55 = vpop.f32.mrb[28].mxu0 }
 0x193   : > { %v1489_v56 = vpop.f32.mrb[29].mxu0 }
 0x194   : > { %v1568_v57 = vpop.f32.mrb[28].mxu1  ;;  %v2852_v58 = vadd.f32 %v1567_v53, %v612_v54  ;;  %v1490_v60 = vadd.f32 %v1489_v56, %v1488_v55 }
 0x195   : > { %v1569_v61 = vpop.f32.mrb[29].mxu1 }
 0x196   : > { %v1570_v62 = vadd.f32 %v1569_v61, %v1568_v57  ;;  %v617_v63 = vadd.f32 %v1490_v60, %v2810_v1  ;;  %v1491_v0 = vpop.f32.mrb[30].mxu0 }
 0x197   : > { %v1492_v2 = vpop.f32.mrb[31].mxu0 }
 0x198   : > { %v1571_v3 = vpop.f32.mrb[30].mxu1  ;;  %v2855_v5 = vadd.f32 %v1570_v62, %v617_v63  ;;  %v1493_v6 = vadd.f32 %v1492_v2, %v1491_v0 }
 0x199   : > { %v1572_v7 = vpop.f32.mrb[31].mxu1 }
 0x19a   : > { %v1573_v8 = vadd.f32 %v1572_v7, %v1571_v3  ;;  %v622_v9 = vadd.f32 %v1493_v6, %v2810_v1  ;;  %v1606_v10 = vpop.f32.mrb[32].mxu0 }
 0x19b   : > { %v1607_v12 = vpop.f32.mrb[33].mxu0 }
 0x19c   : > { %v1686_v14 = vpop.f32.mrb[32].mxu1  ;;  %v2858_v15 = vadd.f32 %v1573_v8, %v622_v9  ;;  %v1608_v16 = vadd.f32 %v1607_v12, %v1606_v10 }
 0x19d   : > { %v1687_v17 = vpop.f32.mrb[33].mxu1 }
 0x19e   : > { %v1688_v18 = vadd.f32 %v1687_v17, %v1686_v14  ;;  %v837_v20 = vadd.f32 %v1608_v16, %v2813_v11  ;;  %v1609_v21 = vpop.f32.mrb[34].mxu0 }
 0x19f   : > { %v1610_v23 = vpop.f32.mrb[35].mxu0 }
 0x1a0   : > { %v1689_v24 = vpop.f32.mrb[34].mxu1  ;;  %v982_v25 = vadd.f32 %v1688_v18, %v837_v20  ;;  %v1611_v26 = vadd.f32 %v1610_v23, %v1609_v21 }
 0x1a1   : > { %v1690_v28 = vpop.f32.mrb[35].mxu1 }
 0x1a2   : > { %v1691_v29 = vadd.f32 %v1690_v28, %v1689_v24  ;;  %1061 = vst.msk [vmem:[%s2862_s10] sm:$0xff] %vm1060_vm0, %v982_v25  ;;  %v842_v1 = vadd.f32 %v1611_v26, %v2816_v19  ;;  %v1612_v30 = vpop.f32.mrb[36].mxu0 }
 0x1a3   : > { %v1613_v32 = vpop.f32.mrb[37].mxu0 }
 0x1a4   : > { %v1692_v11 = vpop.f32.mrb[36].mxu1  ;;  %v987_v33 = vadd.f32 %v1691_v29, %v842_v1  ;;  %v1614_v34 = vadd.f32 %v1613_v32, %v1612_v30 }
 0x1a5   : > { %v1693_v36 = vpop.f32.mrb[37].mxu1 }
 0x1a6   : > { %v1694_v37 = vadd.f32 %v1693_v36, %v1692_v11  ;;  %1062 = vst.msk [vmem:[%s2862_s10 + $0x8] sm:$0xff] %vm1060_vm0, %v987_v33  ;;  %v847_v38 = vadd.f32 %v1614_v34, %v2819_v27  ;;  %v1615_v39 = vpop.f32.mrb[38].mxu0 }
 0x1a7   : > { %v1616_v41 = vpop.f32.mrb[39].mxu0 }
 0x1a8   : > { %v1695_v42 = vpop.f32.mrb[38].mxu1  ;;  %v992_v44 = vadd.f32 %v1694_v37, %v847_v38  ;;  %v1617_v45 = vadd.f32 %v1616_v41, %v1615_v39 }
 0x1a9   : > { %v1696_v46 = vpop.f32.mrb[39].mxu1 }
 0x1aa   : > { %v1697_v19 = vadd.f32 %v1696_v46, %v1695_v42  ;;  %1063 = vst.msk [vmem:[%s2862_s10 + $0x10] sm:$0xff] %vm1060_vm0, %v992_v44  ;;  %v852_v47 = vadd.f32 %v1617_v45, %v2822_v35  ;;  %v1618_v48 = vpop.f32.mrb[40].mxu0 }
 0x1ab   : > { %v1619_v50 = vpop.f32.mrb[41].mxu0 }
 0x1ac   : > { %v1698_v52 = vpop.f32.mrb[40].mxu1  ;;  %v997_v53 = vadd.f32 %v1697_v19, %v852_v47  ;;  %v1620_v54 = vadd.f32 %v1619_v50, %v1618_v48 }
 0x1ad   : > { %v1699_v55 = vpop.f32.mrb[41].mxu1 }
 0x1ae   : > { %v1700_v27 = vadd.f32 %v1699_v55, %v1698_v52  ;;  %1064 = vst.msk [vmem:[%s2862_s10 + $0x18] sm:$0xff] %vm1060_vm0, %v997_v53  ;;  %v857_v56 = vadd.f32 %v1620_v54, %v2825_v43  ;;  %v1621_v57 = vpop.f32.mrb[42].mxu0 }
 0x1af   : > { %v1622_v60 = vpop.f32.mrb[43].mxu0 }
 0x1b0   : > { %v1701_v61 = vpop.f32.mrb[42].mxu1  ;;  %v1002_v62 = vadd.f32 %v1700_v27, %v857_v56  ;;  %v1623_v63 = vadd.f32 %v1622_v60, %v1621_v57 }
 0x1b1   : > { %v1702_v0 = vpop.f32.mrb[43].mxu1 }
 0x1b2   : > { %v1703_v35 = vadd.f32 %v1702_v0, %v1701_v61  ;;  %1065 = vst.msk [vmem:[%s2862_s10 + $0x20] sm:$0xff] %vm1060_vm0, %v1002_v62  ;;  %v862_v2 = vadd.f32 %v1623_v63, %v2828_v51  ;;  %v1624_v3 = vpop.f32.mrb[44].mxu0 }
 0x1b3   : > { %v1625_v6 = vpop.f32.mrb[45].mxu0 }
 0x1b4   : > { %v1704_v7 = vpop.f32.mrb[44].mxu1  ;;  %v1007_v8 = vadd.f32 %v1703_v35, %v862_v2  ;;  %v1626_v9 = vadd.f32 %v1625_v6, %v1624_v3 }
 0x1b5   : > { %v1705_v10 = vpop.f32.mrb[45].mxu1 }
 0x1b6   : > { %v1706_v43 = vadd.f32 %v1705_v10, %v1704_v7  ;;  %1066 = vst.msk [vmem:[%s2862_s10 + $0x28] sm:$0xff] %vm1060_vm0, %v1007_v8  ;;  %v867_v12 = vadd.f32 %v1626_v9, %v2831_v59  ;;  %v1627_v14 = vpop.f32.mrb[46].mxu0 }
 0x1b7   : > { %v1628_v16 = vpop.f32.mrb[47].mxu0 }
 0x1b8   : > { %v1707_v17 = vpop.f32.mrb[46].mxu1  ;;  %v1012_v18 = vadd.f32 %v1706_v43, %v867_v12  ;;  %v1629_v20 = vadd.f32 %v1628_v16, %v1627_v14 }
 0x1b9   : > { %v1708_v21 = vpop.f32.mrb[47].mxu1 }
 0x1ba   : > { %v1709_v51 = vadd.f32 %v1708_v21, %v1707_v17  ;;  %1067 = vst.msk [vmem:[%s2862_s10 + $0x30] sm:$0xff] %vm1060_vm0, %v1012_v18  ;;  %v872_v23 = vadd.f32 %v1629_v20, %v2834_v4  ;;  %v1630_v24 = vpop.f32.mrb[48].mxu0 }
 0x1bb   : > { %v1631_v25 = vpop.f32.mrb[49].mxu0 }
 0x1bc   : > { %v1710_v26 = vpop.f32.mrb[48].mxu1  ;;  %v1017_v28 = vadd.f32 %v1709_v51, %v872_v23  ;;  %v1632_v29 = vadd.f32 %v1631_v25, %v1630_v24 }
 0x1bd   : > { %v1711_v1 = vpop.f32.mrb[49].mxu1 }
 0x1be   : > { %v1712_v59 = vadd.f32 %v1711_v1, %v1710_v26  ;;  %1068 = vst.msk [vmem:[%s2862_s10 + $0x38] sm:$0xff] %vm1060_vm0, %v1017_v28  ;;  %v877_v30 = vadd.f32 %v1632_v29, %v2837_v13  ;;  %v1633_v32 = vpop.f32.mrb[50].mxu0 }
 0x1bf   : > { %v1634_v11 = vpop.f32.mrb[51].mxu0 }
 0x1c0   : > { %v1713_v33 = vpop.f32.mrb[50].mxu1  ;;  %v1022_v34 = vadd.f32 %v1712_v59, %v877_v30  ;;  %v1635_v36 = vadd.f32 %v1634_v11, %v1633_v32 }
 0x1c1   : > { %v1714_v37 = vpop.f32.mrb[51].mxu1 }
 0x1c2   : > { %v1715_v4 = vadd.f32 %v1714_v37, %v1713_v33  ;;  %1069 = vst.msk [vmem:[%s2862_s10 + $0x40] sm:$0xff] %vm1060_vm0, %v1022_v34  ;;  %v882_v38 = vadd.f32 %v1635_v36, %v2840_v22  ;;  %v1636_v39 = vpop.f32.mrb[52].mxu0 }
 0x1c3   : > { %v1637_v41 = vpop.f32.mrb[53].mxu0 }
 0x1c4   : > { %v1716_v42 = vpop.f32.mrb[52].mxu1  ;;  %v1027_v44 = vadd.f32 %v1715_v4, %v882_v38  ;;  %v1638_v45 = vadd.f32 %v1637_v41, %v1636_v39 }
 0x1c5   : > { %v1717_v46 = vpop.f32.mrb[53].mxu1 }
 0x1c6   : > { %v1718_v13 = vadd.f32 %v1717_v46, %v1716_v42  ;;  %1070 = vst.msk [vmem:[%s2862_s10 + $0x48] sm:$0xff] %vm1060_vm0, %v1027_v44  ;;  %v887_v19 = vadd.f32 %v1638_v45, %v2843_v31  ;;  %v1639_v47 = vpop.f32.mrb[54].mxu0 }
 0x1c7   : > { %v1640_v48 = vpop.f32.mrb[55].mxu0 }
 0x1c8   : > { %v1719_v50 = vpop.f32.mrb[54].mxu1  ;;  %v1032_v52 = vadd.f32 %v1718_v13, %v887_v19  ;;  %v1641_v53 = vadd.f32 %v1640_v48, %v1639_v47 }
 0x1c9   : > { %v1720_v54 = vpop.f32.mrb[55].mxu1 }
 0x1ca   : > { %v1721_v22 = vadd.f32 %v1720_v54, %v1719_v50  ;;  %1071 = vst.msk [vmem:[%s2862_s10 + $0x50] sm:$0xff] %vm1060_vm0, %v1032_v52  ;;  %v892_v55 = vadd.f32 %v1641_v53, %v2846_v40  ;;  %v1642_v27 = vpop.f32.mrb[56].mxu0 }
 0x1cb   : > { %v1643_v56 = vpop.f32.mrb[57].mxu0 }
 0x1cc   : > { %v1722_v57 = vpop.f32.mrb[56].mxu1  ;;  %v1037_v60 = vadd.f32 %v1721_v22, %v892_v55  ;;  %v1644_v61 = vadd.f32 %v1643_v56, %v1642_v27 }
 0x1cd   : > { %v1723_v62 = vpop.f32.mrb[57].mxu1 }
 0x1ce   : > { %v1724_v31 = vadd.f32 %v1723_v62, %v1722_v57  ;;  %1072 = vst.msk [vmem:[%s2862_s10 + $0x58] sm:$0xff] %vm1060_vm0, %v1037_v60  ;;  %v897_v63 = vadd.f32 %v1644_v61, %v2849_v49  ;;  %v1645_v0 = vpop.f32.mrb[58].mxu0 }
 0x1cf   : > { %v1646_v35 = vpop.f32.mrb[59].mxu0 }
 0x1d0   : > { %v1725_v2 = vpop.f32.mrb[58].mxu1  ;;  %v1042_v3 = vadd.f32 %v1724_v31, %v897_v63  ;;  %v1647_v6 = vadd.f32 %v1646_v35, %v1645_v0 }
 0x1d1   : > { %v1726_v7 = vpop.f32.mrb[59].mxu1 }
 0x1d2   : > { %v1727_v40 = vadd.f32 %v1726_v7, %v1725_v2  ;;  %1073 = vst.msk [vmem:[%s2862_s10 + $0x60] sm:$0xff] %vm1060_vm0, %v1042_v3  ;;  %v902_v8 = vadd.f32 %v1647_v6, %v2852_v58  ;;  %v1648_v9 = vpop.f32.mrb[60].mxu0 }
 0x1d3   : > { %v1649_v10 = vpop.f32.mrb[61].mxu0 }
 0x1d4   : > { %v1728_v43 = vpop.f32.mrb[60].mxu1  ;;  %v1047_v12 = vadd.f32 %v1727_v40, %v902_v8  ;;  %v1650_v14 = vadd.f32 %v1649_v10, %v1648_v9 }
 0x1d5   : > { %v1729_v49 = vpop.f32.mrb[61].mxu1 }
 0x1d6   : > { %v1730_v16 = vadd.f32 %v1729_v49, %v1728_v43  ;;  %1074 = vst.msk [vmem:[%s2862_s10 + $0x68] sm:$0xff] %vm1060_vm0, %v1047_v12  ;;  %v907_v17 = vadd.f32 %v1650_v14, %v2855_v5  ;;  %v1651_v18 = vpop.f32.mrb[62].mxu0 }
 0x1d7   : > { %v1652_v20 = vpop.f32.mrb[63].mxu0 }
 0x1d8   : > { %v1731_v21 = vpop.f32.mrb[62].mxu1  ;;  %v1052_v51 = vadd.f32 %v1730_v16, %v907_v17  ;;  %v1653_v23 = vadd.f32 %v1652_v20, %v1651_v18  ;;  %1083 = sbr.rel (!%p3031_p6) target bundleno = 528 (0x210), region = 44 }
 0x1d9   : > { %v1732_v24 = vpop.f32.mrb[63].mxu1 }
 0x1da   : > { %v1733_v58 = vadd.f32 %v1732_v24, %v1731_v21  ;;  %1075 = vst.msk [vmem:[%s2862_s10 + $0x70] sm:$0xff] %vm1060_vm0, %v1052_v51  ;;  %v912_v25 = vadd.f32 %v1653_v23, %v2858_v15 }
 0x1dc   : > { %v1057_v26 = vadd.f32 %v1733_v58, %v912_v25 }
 0x1de   : > { %1076 = vst.msk [vmem:[%s2862_s10 + $0x78] sm:$0xff] %vm1060_vm0, %v1057_v26 }
 0x1df   : > { %s3042_s12 = smov (!%p1086_p7, %s1085_s12), 16 }
 0x1e0   : > { %s1393_s27 = sshll.u32 %s3042_s12, 7 }
 0x1e1   : > { %p1396_p9 = scmp.eq.s32.totalorder %s1393_s27, 0 }
 0x1e2   : > { %s2924_s23 = sshrl.u32 (!%p1396_p9), %s3042_s12, 4 }
 0x1e3   : > { %1094 = sbr.rel (%p1396_p9) target bundleno = 528 (0x210), region = 48  ;;  %p1397_p12 = scmp.le.s32.totalorder (!%p1396_p9), %s2924_s23, 0 }
 0x1ea   : > { %1317 = sbr.rel (%p1397_p12) target bundleno = 507 (0x1fb), region = 130  ;;  %s3032_s16 = smov (!%p1397_p12), %s2918_s25 }
 0x1eb   : > { %s3033_s26 = smov (!%p1397_p12), %s2862_s10  ;;  %s2933_s30 = smov (!%p1397_p12), 0  }
 0x1ec   : > { %s2935_s4 = smov (!%p1397_p12), 0  }
 0x1f1 LB: >> { %v1186_v5 = vld [vmem:[%s2106_s26] sm:$0xff]  ;;  %v1188_v15 = vld [vmem:[%s2106_s26 + $0x8] sm:$0xff]  ;;  %v1190_v28 = vld [vmem:[%s2106_s26 + $0x10] sm:$0xff]  ;;  %s1218_s24 = sadd.s32 1, %s2110_s30  ;;  %s1180_s4 = sadd.s32 1, %s2114_s4   ;;  %s2114_s4 = sphi %s2935_s4, %s1180_s4   ;;  %s2110_s30 = sphi %s2933_s30, %s3034_s30   ;;  %s2106_s26 = sphi %s3033_s26, %s1223_s26   ;;  %s2102_s16 = sphi %s3032_s16, %s1224_s16  }
 0x1f2   : >> { %1187 = vst [vmem:[%s2102_s16] sm:$0xff] %v1186_v5  ;;  %1189 = vst [vmem:[%s2102_s16 + $0x8] sm:$0xff] %v1188_v15  ;;  %v1192_v29 = vld [vmem:[%s2106_s26 + $0x18] sm:$0xff]  ;;  %v1194_v1 = vld [vmem:[%s2106_s26 + $0x20] sm:$0xff]  ;;  %p1219_p0 = scmp.ge.s32.totalorder %s1218_s24, %s2924_s23  ;;  %p1179_p2 = scmp.ge.s32.totalorder %s1180_s4, %s2924_s23 }
 0x1f3   : >> { %1191 = vst [vmem:[%s2102_s16 + $0x10] sm:$0xff] %v1190_v28  ;;  %v1196_v59 = vld [vmem:[%s2106_s26 + $0x28] sm:$0xff]  ;;  %1193 = vst [vmem:[%s2102_s16 + $0x18] sm:$0xff] %v1192_v29  ;;  %v1198_v30 = vld [vmem:[%s2106_s26 + $0x30] sm:$0xff] }
 0x1f4   : >> { %1195 = vst [vmem:[%s2102_s16 + $0x20] sm:$0xff] %v1194_v1  ;;  %1197 = vst [vmem:[%s2102_s16 + $0x28] sm:$0xff] %v1196_v59  ;;  %v1200_v32 = vld [vmem:[%s2106_s26 + $0x38] sm:$0xff]  ;;  %v1202_v11 = vld [vmem:[%s2106_s26 + $0x40] sm:$0xff]  ;;  %s3044_s24 = smov (%p1219_p0, %s1218_s24), 0  ;;  %1182 = sbr.rel (!%p1179_p2) target bundleno = 497 (0x1f1), region = 136 }
 0x1f5   : >> { %1199 = vst [vmem:[%s2102_s16 + $0x30] sm:$0xff] %v1198_v30  ;;  %1201 = vst [vmem:[%s2102_s16 + $0x38] sm:$0xff] %v1200_v32  ;;  %v1204_v33 = vld [vmem:[%s2106_s26 + $0x48] sm:$0xff]  ;;  %v1206_v34 = vld [vmem:[%s2106_s26 + $0x50] sm:$0xff]  ;;  %s1398_s28 = sshll.u32 %s3044_s24, 7  ;;  %s3034_s30 = smov %s3044_s24 }
 0x1f6   : >> { %1203 = vst [vmem:[%s2102_s16 + $0x40] sm:$0xff] %v1202_v11  ;;  %v1208_v36 = vld [vmem:[%s2106_s26 + $0x58] sm:$0xff]  ;;  %1205 = vst [vmem:[%s2102_s16 + $0x48] sm:$0xff] %v1204_v33  ;;  %v1210_v37 = vld [vmem:[%s2106_s26 + $0x60] sm:$0xff] }
 0x1f7   : >> { %1207 = vst [vmem:[%s2102_s16 + $0x50] sm:$0xff] %v1206_v34  ;;  %1209 = vst [vmem:[%s2102_s16 + $0x58] sm:$0xff] %v1208_v36  ;;  %v1212_v4 = vld [vmem:[%s2106_s26 + $0x68] sm:$0xff]  ;;  %v1214_v38 = vld [vmem:[%s2106_s26 + $0x70] sm:$0xff] }
 0x1f8   : >> { %1211 = vst [vmem:[%s2102_s16 + $0x60] sm:$0xff] %v1210_v37  ;;  %1213 = vst [vmem:[%s2102_s16 + $0x68] sm:$0xff] %v1212_v4  ;;  %v1216_v39 = vld [vmem:[%s2106_s26 + $0x78] sm:$0xff]  ;;  %s1223_s26 = scalar_lea.vmem %s2862_s10, %s1398_s28 [#allocation6]  }
 0x1f9   : >> { %1215 = vst [vmem:[%s2102_s16 + $0x70] sm:$0xff] %v1214_v38  ;;  %1217 = vst [vmem:[%s2102_s16 + $0x78] sm:$0xff] %v1216_v39  ;;  %s1224_s16 = scalar_lea.vmem %s2918_s25, %s1398_s28  }
 0x1fb PF: > { %s2993_s29 = sand.u32 15, %s3042_s12   ;;  %s1412_s5 = sshll.u32 %s2924_s23, 7 }
 0x1fc   : > { %s1229_s6 = scalar_lea.vmem %s2862_s10, %s1412_s5 [#allocation6]   ;;  %s1231_s8 = scalar_lea.vmem %s2918_s25, %s1412_s5  }
 0x1fd   : > { %p1403_p5 = scmp.le.s32.totalorder %s2993_s29, 0 }
 0x1fe   : > { %s2116_s22 = smov (!%p1403_p5), %s1231_s8   ;;  %s2120_s9 = smov (!%p1403_p5), %s1229_s6  }
 0x1ff   : > { %1331 = sbr.rel (%p1403_p5) target bundleno = 528 (0x210), region = 141  ;;  %s2124_s15 = smov (!%p1403_p5), 0  }
 0x200   : > { %s2128_s7 = smov (!%p1403_p5), 0  }
 0x206 LB: >> { %v1241_v41 = vld [vmem:[%s2122_s9] sm:$0xff]  ;;  %s1243_s21 = sadd.s32 1, %s2126_s15  ;;  %s1235_s7 = sadd.s32 1, %s2130_s7   ;;  %s2130_s7 = sphi %s2128_s7, %s1235_s7   ;;  %s2126_s15 = sphi %s2124_s15, %s2125_s15   ;;  %s2122_s9 = sphi %s2120_s9, %s1248_s9   ;;  %s2118_s22 = sphi %s2116_s22, %s1249_s22  }
 0x207   : >> { %1242 = vst [vmem:[%s2118_s22] sm:$0xff] %v1241_v41  ;;  %p1244_p8 = scmp.ge.s32.totalorder %s1243_s21, %s2993_s29  ;;  %p1234_p10 = scmp.ge.s32.totalorder %s1235_s7, %s2993_s29 }
 0x209   : >> { %s3046_s21 = smov (%p1244_p8, %s1243_s21), 0  ;;  %1237 = sbr.rel (!%p1234_p10) target bundleno = 518 (0x206), region = 147 }
 0x20a   : >> { %s1404_s10 = sshll.u32 %s3046_s21, 3  ;;  %s2125_s15 = smov %s3046_s21  }
 0x20b   : >> { %s1248_s9 = scalar_lea.vmem %s1229_s6, %s1404_s10 [#allocation6]   ;;  %s1249_s22 = scalar_lea.vmem %s1231_s8, %s1404_s10  }
 0x210 PF: > { %p14_p13 = scmp.ge.s32.totalorder %s2178_s17, 5   ;;  %s3035_s12 = smov %s2090_s13 }
 0x211   : > { %s3036_s13 = smov %s2094_s14  ;;  %s3037_s14 = smov %s2188_s20 }
 0x212   : > { %s3038_s15 = smov %s2178_s17  ;;  %16 = sbr.rel (!%p14_p13) target bundleno = 4 (0x4), region = 158 }
 0x219   :  { %1265 = vsyncpa [#allocation3], 1 }
 0x21a   :  { %1267 = vsyncpa [#allocation3 + $0x1], 1 }
 0x21b   :  { %1268 = vsyncpa [#allocation5], 1 }

</bundles_post_ra>
